<compile_context>
chip_gen: v7x
topology: tpu7x:2x2x1
jax: 0.10.0
libtpu: 0.0.40
codegen_flags: <defaults>
</compile_context>

<pallas_src>
import math
import functools

import jax
import jax.numpy as jnp
from jax.experimental import pallas as pl
from jax.experimental.pallas import tpu as pltpu

LEAKY_SLOPE = 0.01                  # F.leaky_relu default negative_slope
BN_EPS = 1e-5                       # nn.BatchNorm2d default eps
LANE = 128
VMEM_LIMIT = 48 * 1024 * 1024       # headroom under v7x's 64 MiB physical VMEM


def _round_up(x, m):
    return ((x + m - 1) // m) * m


def _leaky_relu(x):
    # max(x, a*x) == leaky_relu(x) for 0 < a < 1  (mul+max instead of cmp+mul+sel).
    return jnp.maximum(x, LEAKY_SLOPE * x)


# ------------------------------- fused kernel ------------------------------- #

def _stgcn_fused_kernel(x_ref, wg1_ref, bg1_ref, thb_ref, a_ref,
                        wg2_ref, bg2_ref, sc_ref, sh_ref, o_ref, *, g1, g2):
    """Whole STGCNBlock forward for one batch element.

    x_ref  : (N, T*Cin)     raw input rows, channels flattened into lanes
    wg1_ref: (T*Cin, 3*G1)  banded conv-as-matrix [conv1|conv2|conv3] of temporal1,
                            G1 = round_up(T1*Cout, 128)  (vreg-aligned gate blocks)
    bg1_ref: (1, 3*G1)
    thb_ref: (G1, T1*S)     block-diagonal Theta1 (zero rows over the padding)
    a_ref  : (N, N)         A_hat
    wg2_ref: (T1*S, 3*G2)   banded conv-as-matrix of temporal2
    bg2_ref: (1, 3*G2)
    sc_ref : (N, 1)         eval-mode BatchNorm2d(num_nodes) scale
    sh_ref : (N, 1)         eval-mode BatchNorm2d(num_nodes) shift
    o_ref  : (N, G2)        lane-dense output slab, G2 = round_up(T2*Cout, 128)
    """
    # ---- temporal1: 1xK convs as one banded matmul + gate ------------------ #
    y = jnp.dot(x_ref[...], wg1_ref[...], preferred_element_type=jnp.float32)
    y = y + bg1_ref[...]
    t1 = _leaky_relu(y[:, :g1] + jax.nn.sigmoid(y[:, g1:2 * g1]) + y[:, 2 * g1:])
    # TODO(synk): nn.Dropout is stochastic in train mode; inference => identity.

    # ---- Theta1 projection (applied before A_hat; both linear, exact up to
    #      float reassociation) ---------------------------------------------- #
    u = jnp.dot(t1, thb_ref[...], preferred_element_type=jnp.float32)   # (N, T1*S)

    # ---- graph aggregation: leaky_relu(A_hat @ u), all in VMEM ------------- #
    t2 = _leaky_relu(jnp.dot(a_ref[...], u, preferred_element_type=jnp.float32))

    # ---- temporal2: banded matmul + gate ------------------------------------ #
    y2 = jnp.dot(t2, wg2_ref[...], preferred_element_type=jnp.float32)
    y2 = y2 + bg2_ref[...]
    t3 = _leaky_relu(y2[:, :g2] + jax.nn.sigmoid(y2[:, g2:2 * g2]) + y2[:, 2 * g2:])

    # ---- eval-mode BatchNorm2d(num_nodes): per-node affine ------------------ #
    # TODO(synk): train-mode BatchNorm (batch statistics) is not modeled.
    o_ref[...] = t3 * sc_ref[...] + sh_ref[...]


# ------------------------------ weight packing ------------------------------ #

def _band_conv_matrices(block_params, T):
    """Pack a TimeBlock's three 1xK convs as banded conv-as-matmul matrices.

    A 1xK conv over a channels-last (T, Cin) signal equals one matmul with a
    banded (T*Cin, T_out*Cout) matrix.  Each gate block is zero-padded to
    G = round_up(T_out*Cout, 128) lanes so in-kernel gate slices are
    whole-vreg aligned (padded bias lanes stay 0 -> sigmoid pad = 0.5, which is
    killed by zero rows/columns downstream or sliced off at the end).
    """
    K, Cin, Cout = block_params["w1"].shape
    T_out = T - K + 1
    G = _round_up(T_out * Cout, LANE)

    def band(w, b):
        blk = w.reshape(K * Cin, Cout)                       # tap-major rows
        wm = jnp.zeros((T * Cin, T_out * Cout), jnp.float32)
        for t in range(T_out):                               # static, tiny loop
            wm = jax.lax.dynamic_update_slice(wm, blk, (t * Cin, t * Cout))
        wm = jnp.pad(wm, ((0, 0), (0, G - T_out * Cout)))
        bias = jnp.pad(jnp.tile(b, T_out), (0, G - T_out * Cout))
        return wm, bias

    ws, bs = zip(*(band(block_params[f"w{i}"], block_params[f"b{i}"])
                   for i in (1, 2, 3)))
    return (jnp.concatenate(ws, axis=1),
            jnp.concatenate(bs).reshape(1, 3 * G), G, T_out)


def _theta_block_diag(theta, T_out, G):
    """Theta1 replicated block-diagonally over the T_out time steps."""
    Cout, S = theta.shape
    tb = jnp.zeros((T_out * Cout, T_out * S), jnp.float32)
    for t in range(T_out):
        tb = jax.lax.dynamic_update_slice(tb, theta, (t * Cout, t * S))
    return jnp.pad(tb, ((0, G - T_out * Cout), (0, 0)))      # zero pad rows


# --------------------------------- wrapper ---------------------------------- #

def stgcn_block(X, A_hat, params):
    """X: (B, N, T, in_channels), A_hat: (N, N) -> (B, N, T-4, out_channels)."""
    B, N, T, Cin = X.shape
    theta = params["theta1"]
    Cout = params["temporal1"]["w1"].shape[2]
    S = theta.shape[1]

    # Parameter-only packing (tiny; depends on T, so built here under jit).
    wg1, bg1, G1, T1 = _band_conv_matrices(params["temporal1"], T)
    theta_b = _theta_block_diag(theta, T1, G1)
    wg2, bg2, G2, T2 = _band_conv_matrices(params["temporal2"], T1)

    scale = params["bn_gamma"] * jax.lax.rsqrt(params["bn_var"] + BN_EPS)
    shift = params["bn_beta"] - params["bn_mean"] * scale
    scale = scale.reshape(N, 1).astype(jnp.float32)
    shift = shift.reshape(N, 1).astype(jnp.float32)

    x_flat = X.reshape(B, N, T * Cin)                 # contiguous -> free reshape

    flops = 2 * B * N * (T * Cin * 3 * G1 + G1 * T1 * S + N * T1 * S
                         + T1 * S * 3 * G2)
    cost = pl.CostEstimate(
        flops=int(flops),
        transcendentals=int(B * N * (G1 + G2)),
        bytes_accessed=int(4 * (x_flat.size + wg1.size + bg1.size + theta_b.size
                                + A_hat.size + wg2.size + bg2.size + 2 * N
                                + B * N * G2)))

    out_flat = pl.pallas_call(
        functools.partial(_stgcn_fused_kernel, g1=G1, g2=G2),
        out_shape=jax.ShapeDtypeStruct((B, N, G2), jnp.float32),
        grid=(B,),
        in_specs=[
            pl.BlockSpec((None, N, T * Cin), lambda b: (b, 0, 0)),
            pl.BlockSpec((T * Cin, 3 * G1), lambda b: (0, 0)),
            pl.BlockSpec((1, 3 * G1), lambda b: (0, 0)),
            pl.BlockSpec((G1, T1 * S), lambda b: (0, 0)),
            pl.BlockSpec((N, N), lambda b: (0, 0)),
            pl.BlockSpec((T1 * S, 3 * G2), lambda b: (0, 0)),
            pl.BlockSpec((1, 3 * G2), lambda b: (0, 0)),
            pl.BlockSpec((N, 1), lambda b: (0, 0)),
            pl.BlockSpec((N, 1), lambda b: (0, 0)),
        ],
        out_specs=pl.BlockSpec((None, N, G2), lambda b: (b, 0, 0)),
        compiler_params=pltpu.CompilerParams(
            dimension_semantics=("parallel",),          # megacore shards batches
            vmem_limit_bytes=VMEM_LIMIT),
        cost_estimate=cost,
    )(x_flat, wg1, bg1, theta_b, A_hat, wg2, bg2, scale, shift)

    valid = T2 * Cout
    if G2 != valid:                                     # drop padded gate lanes
        out_flat = out_flat[..., :valid]
    return out_flat.reshape(B, N, T2, Cout)


# -------------------------------- parameters -------------------------------- #

def init_params(key, in_channels, spatial_channels, out_channels, num_nodes, K=3):
    keys = iter(jax.random.split(key, 20))

    def conv2d(cin, cout):
        # PyTorch Conv2d(cin, cout, (1, K)) default init; weight (cout, cin, 1, K).
        bound = 1.0 / math.sqrt(cin * K)
        w_pt = jax.random.uniform(next(keys), (cout, cin, K), jnp.float32,
                                  -bound, bound)
        b = jax.random.uniform(next(keys), (cout,), jnp.float32, -bound, bound)
        return jnp.transpose(w_pt, (2, 1, 0)), b        # (K, cin, cout)

    def temporal(cin, cout):
        p = {}
        for i in (1, 2, 3):
            p[f"w{i}"], p[f"b{i}"] = conv2d(cin, cout)
        return p

    t1 = temporal(in_channels, out_channels)
    t2 = temporal(spatial_channels, out_channels)

    stdv = 1.0 / math.sqrt(spatial_channels)
    theta = jax.random.uniform(next(keys), (out_channels, spatial_channels),
                               jnp.float32, -stdv, stdv)

    bn_gamma = jax.random.uniform(next(keys), (num_nodes,), jnp.float32, 0.8, 1.2)
    bn_beta = jax.random.uniform(next(keys), (num_nodes,), jnp.float32, -0.1, 0.1)
    bn_mean = jax.random.uniform(next(keys), (num_nodes,), jnp.float32, -0.1, 0.1)
    bn_var = jax.random.uniform(next(keys), (num_nodes,), jnp.float32, 0.5, 1.5)

    return {"temporal1": t1, "temporal2": t2, "theta1": theta,
            "bn_gamma": bn_gamma, "bn_beta": bn_beta,
            "bn_mean": bn_mean, "bn_var": bn_var}


# ---------------------------- pure-JAX reference ----------------------------- #

def _timeblock_ref(x, p):
    K, _, Cout = p["w1"].shape
    T_out = x.shape[2] - K + 1

    def conv(w, b):
        acc = jnp.zeros(x.shape[:2] + (T_out, Cout), jnp.float32) + b
        for k in range(K):
            acc = acc + jnp.einsum('bnti,io->bnto', x[:, :, k:k + T_out, :], w[k])
        return acc

    pre = (conv(p["w1"], p["b1"]) + jax.nn.sigmoid(conv(p["w2"], p["b2"]))
           + conv(p["w3"], p["b3"]))
    return jnp.where(pre > 0, pre, LEAKY_SLOPE * pre)


def stgcn_block_ref(X, A_hat, params):
    t1 = _timeblock_ref(X, params["temporal1"])
    lfs = jnp.einsum('ij,bjtc->bitc', A_hat, t1)
    z = jnp.einsum('bitc,cs->bits', lfs, params["theta1"])
    t2 = jnp.where(z > 0, z, LEAKY_SLOPE * z)
    t3 = _timeblock_ref(t2, params["temporal2"])
    scale = params["bn_gamma"] / jnp.sqrt(params["bn_var"] + BN_EPS)
    shift = params["bn_beta"] - params["bn_mean"] * scale
    return t3 * scale[None, :, None, None] + shift[None, :, None, None]


# ----------------------------------- main ------------------------------------ #

if __name__ == "__main__":
    B, N, T = 2, 8, 12
    in_channels, spatial_channels, out_channels = 4, 16, 32

    key = jax.random.PRNGKey(0)
    kx, ka, kp = jax.random.split(key, 3)

    X = jax.random.normal(kx, (B, N, T, in_channels), jnp.float32)
    A = jax.random.uniform(ka, (N, N), jnp.float32)
    A_hat = A / jnp.sum(A, axis=1, keepdims=True)     # row-normalized adjacency

    params = init_params(kp, in_channels, spatial_channels, out_channels, N)

    out = jax.block_until_ready(jax.jit(stgcn_block)(X, A_hat, params))

    assert out.shape == (B, N, T - 4, out_channels), out.shape
    assert bool(jnp.all(jnp.isfinite(out)))

    ref = stgcn_block_ref(X, A_hat, params)
    err = float(jnp.max(jnp.abs(out - ref)))
    assert bool(jnp.allclose(out, ref, rtol=3e-2, atol=3e-2)), f"max abs err {err}"

    print("KERNEL_OK")
</pallas_src>

<mosaic_0001>
module attributes {stable_mosaic.version = 11 : i64} {
  func.func @_stgcn_fused_kernel(%arg0: i32, %arg1: memref<1x8x48xf32, #tpu.memory_space<vmem>>, %arg2: memref<48x1152xf32, #tpu.memory_space<vmem>>, %arg3: memref<1x1152xf32, #tpu.memory_space<vmem>>, %arg4: memref<384x160xf32, #tpu.memory_space<vmem>>, %arg5: memref<8x8xf32, #tpu.memory_space<vmem>>, %arg6: memref<160x768xf32, #tpu.memory_space<vmem>>, %arg7: memref<1x768xf32, #tpu.memory_space<vmem>>, %arg8: memref<8x1xf32, #tpu.memory_space<vmem>>, %arg9: memref<8x1xf32, #tpu.memory_space<vmem>>, %arg10: memref<1x8x256xf32, #tpu.memory_space<vmem>>) attributes {dimension_semantics = [#tpu.dimension_semantics<parallel>], iteration_bounds = array<i64: 2>, scalar_prefetch = 0 : i64, scratch_operands = 0 : i64, tpu.core_type = #tpu.core_type<tc>, window_params = [{transform_indices = @transform_0, window_bounds = array<i64: 1, 8, 48>}, {pipeline_mode = #tpu.pipeline_mode<synchronous>, transform_indices = @transform_1, window_bounds = array<i64: 48, 1152>}, {pipeline_mode = #tpu.pipeline_mode<synchronous>, transform_indices = @transform_2, window_bounds = array<i64: 1, 1152>}, {pipeline_mode = #tpu.pipeline_mode<synchronous>, transform_indices = @transform_3, window_bounds = array<i64: 384, 160>}, {pipeline_mode = #tpu.pipeline_mode<synchronous>, transform_indices = @transform_4, window_bounds = array<i64: 8, 8>}, {pipeline_mode = #tpu.pipeline_mode<synchronous>, transform_indices = @transform_5, window_bounds = array<i64: 160, 768>}, {pipeline_mode = #tpu.pipeline_mode<synchronous>, transform_indices = @transform_6, window_bounds = array<i64: 1, 768>}, {pipeline_mode = #tpu.pipeline_mode<synchronous>, transform_indices = @transform_7, window_bounds = array<i64: 8, 1>}, {pipeline_mode = #tpu.pipeline_mode<synchronous>, transform_indices = @transform_8, window_bounds = array<i64: 8, 1>}, {transform_indices = @transform_9, window_bounds = array<i64: 1, 8, 256>}]} {
    %c0 = arith.constant 0 : index
    %c0_0 = arith.constant 0 : index
    %c0_1 = arith.constant 0 : index
    %0 = vector.load %arg1[%c0, %c0_0, %c0_1] : memref<1x8x48xf32, #tpu.memory_space<vmem>>, vector<1x8x48xf32>
    %1 = vector.shape_cast %0 : vector<1x8x48xf32> to vector<8x48xf32>
    %c0_2 = arith.constant 0 : index
    %c0_3 = arith.constant 0 : index
    %2 = vector.load %arg2[%c0_2, %c0_3] : memref<48x1152xf32, #tpu.memory_space<vmem>>, vector<48x1152xf32>
    %cst = arith.constant dense<0.000000e+00> : vector<8x1152xf32>
    %3 = tpu.matmul %1, %2, %cst {dimension_numbers = #tpu.dot_dimension_numbers<[1], [0], [0], [1], [0, 0, 1, 1], [], []>} : vector<8x48xf32>, vector<48x1152xf32>, vector<8x1152xf32> -> vector<8x1152xf32>
    %c0_4 = arith.constant 0 : index
    %c0_5 = arith.constant 0 : index
    %4 = vector.load %arg3[%c0_4, %c0_5] : memref<1x1152xf32, #tpu.memory_space<vmem>>, vector<1x1152xf32>
    %5 = vector.broadcast %4 : vector<1x1152xf32> to vector<8x1152xf32>
    %6 = arith.addf %3, %5 : vector<8x1152xf32>
    %7 = vector.extract_strided_slice %6 {offsets = [0, 0], sizes = [8, 384], strides = [1, 1]} : vector<8x1152xf32> to vector<8x384xf32>
    %8 = vector.extract_strided_slice %6 {offsets = [0, 384], sizes = [8, 384], strides = [1, 1]} : vector<8x1152xf32> to vector<8x384xf32>
    %9 = arith.negf %8 : vector<8x384xf32>
    %10 = math.exp %9 : vector<8x384xf32>
    %cst_6 = arith.constant 1.000000e+00 : f32
    %11 = vector.broadcast %cst_6 : f32 to vector<8x384xf32>
    %12 = arith.addf %11, %10 : vector<8x384xf32>
    %13 = arith.divf %11, %12 : vector<8x384xf32>
    %14 = arith.addf %7, %13 : vector<8x384xf32>
    %15 = vector.extract_strided_slice %6 {offsets = [0, 768], sizes = [8, 384], strides = [1, 1]} : vector<8x1152xf32> to vector<8x384xf32>
    %16 = arith.addf %14, %15 : vector<8x384xf32>
    %cst_7 = arith.constant 0.00999999977 : f32
    %17 = vector.broadcast %cst_7 : f32 to vector<8x384xf32>
    %18 = arith.mulf %17, %16 : vector<8x384xf32>
    %19 = arith.maximumf %16, %18 : vector<8x384xf32>
    %c0_8 = arith.constant 0 : index
    %c0_9 = arith.constant 0 : index
    %20 = vector.load %arg4[%c0_8, %c0_9] : memref<384x160xf32, #tpu.memory_space<vmem>>, vector<384x160xf32>
    %cst_10 = arith.constant dense<0.000000e+00> : vector<8x160xf32>
    %21 = tpu.matmul %19, %20, %cst_10 {dimension_numbers = #tpu.dot_dimension_numbers<[1], [0], [0], [1], [0, 0, 1, 1], [], []>} : vector<8x384xf32>, vector<384x160xf32>, vector<8x160xf32> -> vector<8x160xf32>
    %c0_11 = arith.constant 0 : index
    %c0_12 = arith.constant 0 : index
    %22 = vector.load %arg5[%c0_11, %c0_12] : memref<8x8xf32, #tpu.memory_space<vmem>>, vector<8x8xf32>
    %cst_13 = arith.constant dense<0.000000e+00> : vector<8x160xf32>
    %23 = tpu.matmul %22, %21, %cst_13 {dimension_numbers = #tpu.dot_dimension_numbers<[1], [0], [0], [1], [0, 0, 1, 1], [], []>} : vector<8x8xf32>, vector<8x160xf32>, vector<8x160xf32> -> vector<8x160xf32>
    %cst_14 = arith.constant 0.00999999977 : f32
    %24 = vector.broadcast %cst_14 : f32 to vector<8x160xf32>
    %25 = arith.mulf %24, %23 : vector<8x160xf32>
    %26 = arith.maximumf %23, %25 : vector<8x160xf32>
    %c0_15 = arith.constant 0 : index
    %c0_16 = arith.constant 0 : index
    %27 = vector.load %arg6[%c0_15, %c0_16] : memref<160x768xf32, #tpu.memory_space<vmem>>, vector<160x768xf32>
    %cst_17 = arith.constant dense<0.000000e+00> : vector<8x768xf32>
    %28 = tpu.matmul %26, %27, %cst_17 {dimension_numbers = #tpu.dot_dimension_numbers<[1], [0], [0], [1], [0, 0, 1, 1], [], []>} : vector<8x160xf32>, vector<160x768xf32>, vector<8x768xf32> -> vector<8x768xf32>
    %c0_18 = arith.constant 0 : index
    %c0_19 = arith.constant 0 : index
    %29 = vector.load %arg7[%c0_18, %c0_19] : memref<1x768xf32, #tpu.memory_space<vmem>>, vector<1x768xf32>
    %30 = vector.broadcast %29 : vector<1x768xf32> to vector<8x768xf32>
    %31 = arith.addf %28, %30 : vector<8x768xf32>
    %32 = vector.extract_strided_slice %31 {offsets = [0, 0], sizes = [8, 256], strides = [1, 1]} : vector<8x768xf32> to vector<8x256xf32>
    %33 = vector.extract_strided_slice %31 {offsets = [0, 256], sizes = [8, 256], strides = [1, 1]} : vector<8x768xf32> to vector<8x256xf32>
    %34 = arith.negf %33 : vector<8x256xf32>
    %35 = math.exp %34 : vector<8x256xf32>
    %cst_20 = arith.constant 1.000000e+00 : f32
    %36 = vector.broadcast %cst_20 : f32 to vector<8x256xf32>
    %37 = arith.addf %36, %35 : vector<8x256xf32>
    %38 = arith.divf %36, %37 : vector<8x256xf32>
    %39 = arith.addf %32, %38 : vector<8x256xf32>
    %40 = vector.extract_strided_slice %31 {offsets = [0, 512], sizes = [8, 256], strides = [1, 1]} : vector<8x768xf32> to vector<8x256xf32>
    %41 = arith.addf %39, %40 : vector<8x256xf32>
    %cst_21 = arith.constant 0.00999999977 : f32
    %42 = vector.broadcast %cst_21 : f32 to vector<8x256xf32>
    %43 = arith.mulf %42, %41 : vector<8x256xf32>
    %44 = arith.maximumf %41, %43 : vector<8x256xf32>
    %c0_22 = arith.constant 0 : index
    %c0_23 = arith.constant 0 : index
    %45 = vector.load %arg8[%c0_22, %c0_23] : memref<8x1xf32, #tpu.memory_space<vmem>>, vector<8x1xf32>
    %46 = vector.broadcast %45 : vector<8x1xf32> to vector<8x256xf32>
    %47 = arith.mulf %44, %46 : vector<8x256xf32>
    %c0_24 = arith.constant 0 : index
    %c0_25 = arith.constant 0 : index
    %48 = vector.load %arg9[%c0_24, %c0_25] : memref<8x1xf32, #tpu.memory_space<vmem>>, vector<8x1xf32>
    %49 = vector.broadcast %48 : vector<8x1xf32> to vector<8x256xf32>
    %50 = arith.addf %47, %49 : vector<8x256xf32>
    %c0_26 = arith.constant 0 : index
    %c0_27 = arith.constant 0 : index
    %c0_28 = arith.constant 0 : index
    %51 = vector.load %arg10[%c0_26, %c0_27, %c0_28] : memref<1x8x256xf32, #tpu.memory_space<vmem>>, vector<1x8x256xf32>
    %52 = vector.shape_cast %51 : vector<1x8x256xf32> to vector<8x256xf32>
    %53 = vector.shape_cast %50 : vector<8x256xf32> to vector<1x8x256xf32>
    tpu.vector_store %arg10[%c0_26, %c0_27, %c0_28], %53 {strides = array<i32>} : memref<1x8x256xf32, #tpu.memory_space<vmem>>, vector<1x8x256xf32>,
    return
  }
  func.func @transform_0(%arg0: i32) -> (i32, i32, i32) {
    %c0_i32 = arith.constant 0 : i32
    %c0_i32_0 = arith.constant 0 : i32
    %c0_i32_1 = arith.constant 0 : i32
    return %arg0, %c0_i32, %c0_i32_0 : i32, i32, i32
  }
  func.func @transform_1(%arg0: i32) -> (i32, i32) {
    %c0_i32 = arith.constant 0 : i32
    %c0_i32_0 = arith.constant 0 : i32
    %c0_i32_1 = arith.constant 0 : i32
    return %c0_i32, %c0_i32_0 : i32, i32
  }
  func.func @transform_2(%arg0: i32) -> (i32, i32) {
    %c0_i32 = arith.constant 0 : i32
    %c0_i32_0 = arith.constant 0 : i32
    %c0_i32_1 = arith.constant 0 : i32
    return %c0_i32, %c0_i32_0 : i32, i32
  }
  func.func @transform_3(%arg0: i32) -> (i32, i32) {
    %c0_i32 = arith.constant 0 : i32
    %c0_i32_0 = arith.constant 0 : i32
    %c0_i32_1 = arith.constant 0 : i32
    return %c0_i32, %c0_i32_0 : i32, i32
  }
  func.func @transform_4(%arg0: i32) -> (i32, i32) {
    %c0_i32 = arith.constant 0 : i32
    %c0_i32_0 = arith.constant 0 : i32
    %c0_i32_1 = arith.constant 0 : i32
    return %c0_i32, %c0_i32_0 : i32, i32
  }
  func.func @transform_5(%arg0: i32) -> (i32, i32) {
    %c0_i32 = arith.constant 0 : i32
    %c0_i32_0 = arith.constant 0 : i32
    %c0_i32_1 = arith.constant 0 : i32
    return %c0_i32, %c0_i32_0 : i32, i32
  }
  func.func @transform_6(%arg0: i32) -> (i32, i32) {
    %c0_i32 = arith.constant 0 : i32
    %c0_i32_0 = arith.constant 0 : i32
    %c0_i32_1 = arith.constant 0 : i32
    return %c0_i32, %c0_i32_0 : i32, i32
  }
  func.func @transform_7(%arg0: i32) -> (i32, i32) {
    %c0_i32 = arith.constant 0 : i32
    %c0_i32_0 = arith.constant 0 : i32
    %c0_i32_1 = arith.constant 0 : i32
    return %c0_i32, %c0_i32_0 : i32, i32
  }
  func.func @transform_8(%arg0: i32) -> (i32, i32) {
    %c0_i32 = arith.constant 0 : i32
    %c0_i32_0 = arith.constant 0 : i32
    %c0_i32_1 = arith.constant 0 : i32
    return %c0_i32, %c0_i32_0 : i32, i32
  }
  func.func @transform_9(%arg0: i32) -> (i32, i32, i32) {
    %c0_i32 = arith.constant 0 : i32
    %c0_i32_0 = arith.constant 0 : i32
    %c0_i32_1 = arith.constant 0 : i32
    return %arg0, %c0_i32, %c0_i32_0 : i32, i32, i32
  }
}

</mosaic_0001>

<bundles_post_ra>
// kernel: tile.33
= control target key start
LH: loop header
LB: loop body
LE: loop exit
PB: predicated region body
PF: predicated region fallthrough
CT: control target
= control target key end

     0   :  { %s28_s0 = inlined_call_operand.vmem [shape: f32[32], index: 0, kind: input, shape index: {}]   ;;  %s29_s1 = inlined_call_operand.vmem [shape: f32[10,32], index: 1, kind: output, shape index: {}]  }
   0x1   :  { %v4_v0 = vld [vmem:[%s28_s0] ss:$0 sm:$0xff] }
   0x2   :  { %5 = vst [vmem:[%s29_s1] sm:$0xff] %v4_v0  ;;  %8 = vst [vmem:[%s29_s1 + $0x8] sm:$0xff] %v4_v0 }

// kernel: tile.34
= control target key start
LH: loop header
LB: loop body
LE: loop exit
PB: predicated region body
PF: predicated region fallthrough
CT: control target
= control target key end

     0   :  { %s6_s6 = smov 3  ;;  %s13_s11 = smov 3  ;;  %vm3_vm0 = vcmask 261120   ;;  %vm10_vm1 = vcmask 1048320   ;;  %vm17_vm2 = vcmask 785920   ;;  %vm23_vm3 = vcmask 523520   ;;  %s65_s0 = inlined_call_operand.vmem [shape: f32[10,32], index: 0, kind: input, shape index: {}]   ;;  %s66_s1 = inlined_call_operand.vmem [shape: f32[320], index: 1, kind: output, shape index: {}]  }
   0x1   :  { %v33_v0 = vld [vmem:[%s65_s0 + $0x1] ss:$4 sm:$0x7]   ;;  %v31_v1 = vld [vmem:[%s65_s0 + $0x3] ss:$4 sm:%s6_s6]   ;;  %s37_s12 = smov 96  }
   0x2   :  { %8 = vrot.lane.b32.xlu0 %v31_v1, %s37_s12  ;;  %v2_v2 = vld [vmem:[%s65_s0] ss:$4 sm:$0x7]   ;;  %v32_v3 = vld [vmem:[%s65_s0 + $0x2] ss:$4 sm:%s13_s11]   ;;  %s38_s0 = smov 32  }
   0x3   :  { %21 = vrot.lane.b32.xlu1 %v33_v0, %s38_s0  ;;  %4 = vst.msk [vmem:[#allocation0] sm:$0x7] %vm3_vm0, %v2_v2   ;;  %s39_s17 = smov 64  }
   0x6   :  { %15 = vrot.lane.b32.xlu0 %v32_v3, %s39_s17 }
  0x74   :  { %v9_v4 = vpop.permute.xlu0 %8  }
  0x75   :  { %11 = vst.msk [vmem:[#allocation0] sm:$0x3] %vm10_vm1, %v9_v4   ;;  %v22_v5 = vpop.permute.xlu1 %21  }
  0x78   :  { %v16_v6 = vpop.permute.xlu0 %15  }
  0x79   :  { %18 = vst.msk [vmem:[#allocation0] sm:$0x3] %vm17_vm2, %v16_v6  }
  0x7a   :  { %24 = vst.msk [vmem:[#allocation0] sm:$0x7] %vm23_vm3, %v22_v5  }
  0x81   :  { %v28_v7 = vld [vmem:[#allocation0] sm:$0xf] }
  0x82   :  { %30 = vst [vmem:[%s66_s1] sm:$0xf] %v28_v7 }

// kernel: tile.48
= control target key start
LH: loop header
LB: loop body
LE: loop exit
PB: predicated region body
PF: predicated region fallthrough
CT: control target
= control target key end

     0   :  { %s22_s0 = inlined_call_operand.vmem [shape: f32[32], index: 0, kind: input, shape index: {}]   ;;  %s23_s1 = inlined_call_operand.vmem [shape: f32[8,32], index: 1, kind: output, shape index: {}]  }
   0x1   :  { %v4_v0 = vld [vmem:[%s22_s0] ss:$0 sm:$0xff] }
   0x2   :  { %5 = vst [vmem:[%s23_s1] sm:$0xff] %v4_v0 }

// kernel: tile.49
= control target key start
LH: loop header
LB: loop body
LE: loop exit
PB: predicated region body
PF: predicated region fallthrough
CT: control target
= control target key end

     0   :  { %s7_s6 = smov 3  ;;  %s14_s9 = smov 3  ;;  %vm4_vm0 = vcmask 261120   ;;  %vm11_vm1 = vcmask 1048320   ;;  %vm18_vm2 = vcmask 785920   ;;  %vm25_vm3 = vcmask 523520   ;;  %s67_s0 = inlined_call_operand.vmem [shape: f32[8,32], index: 0, kind: input, shape index: {}]   ;;  %s68_s1 = inlined_call_operand.vmem [shape: f32[256], index: 1, kind: output, shape index: {}]  }
   0x1   :  { %v33_v0 = vld [vmem:[%s67_s0 + $0x3] ss:$4 sm:%s7_s6]   ;;  %s39_s10 = smov 96   ;;  %s21_s11 = smov 3  ;;  %v34_v1 = vld [vmem:[%s67_s0 + $0x2] ss:$4 sm:%s14_s9]  }
   0x2   :  { %9 = vrot.lane.b32.xlu0 %v33_v0, %s39_s10  ;;  %v35_v2 = vld [vmem:[%s67_s0 + $0x1] ss:$4 sm:%s21_s11]   ;;  %s2_s16 = smov 3  ;;  %s40_s17 = smov 32  }
   0x3   :  { %23 = vrot.lane.b32.xlu1 %v35_v2, %s40_s17  ;;  %v3_v3 = vld [vmem:[%s67_s0] ss:$4 sm:%s2_s16]   ;;  %s41_s0 = smov 64  }
   0x4   :  { %5 = vst.msk [vmem:[#allocation0] sm:$0x3] %vm4_vm0, %v3_v3  }
   0x6   :  { %16 = vrot.lane.b32.xlu0 %v34_v1, %s41_s0 }
  0x74   :  { %v10_v4 = vpop.permute.xlu0 %9  }
  0x75   :  { %12 = vst.msk [vmem:[#allocation0] sm:$0x3] %vm11_vm1, %v10_v4   ;;  %v24_v5 = vpop.permute.xlu1 %23  }
  0x78   :  { %v17_v6 = vpop.permute.xlu0 %16  }
  0x79   :  { %19 = vst.msk [vmem:[#allocation0] sm:$0x3] %vm18_vm2, %v17_v6  }
  0x7a   :  { %26 = vst.msk [vmem:[#allocation0] sm:$0x3] %vm25_vm3, %v24_v5  }
  0x81   :  { %v30_v7 = vld [vmem:[#allocation0] sm:$0x3] }
  0x82   :  { %32 = vst [vmem:[%s68_s1] sm:$0x3] %v30_v7 }

// kernel: stgcn_block.1
= control target key start
LH: loop header
LB: loop body
LE: loop exit
PB: predicated region body
PF: predicated region fallthrough
CT: control target
= control target key end

     0   :  { %s2036_s30 = smov 0   ;;  %s2955_s0 = inlined_call_operand.vmem [shape: f32[2,8,48], index: 0, kind: input, shape index: {}]   ;;  %s2956_s1 = inlined_call_operand.vmem [shape: f32[48,1152], index: 1, kind: input, shape index: {}]   ;;  %s2957_s2 = inlined_call_operand.vmem [shape: f32[1,1152], index: 2, kind: input, shape index: {}]   ;;  %s2958_s3 = inlined_call_operand.vmem [shape: f32[384,160], index: 3, kind: input, shape index: {}]   ;;  %s2959_s4 = inlined_call_operand.vmem [shape: f32[8,8], index: 4, kind: input, shape index: {}]   ;;  %s2960_s5 = inlined_call_operand.vmem [shape: f32[160,768], index: 5, kind: input, shape index: {}]   ;;  %s2961_s6 = inlined_call_operand.vmem [shape: f32[1,768], index: 6, kind: input, shape index: {}]   ;;  %s2962_s7 = inlined_call_operand.vmem [shape: f32[8,1], index: 7, kind: input, shape index: {}]   ;;  %s2963_s8 = inlined_call_operand.vmem [shape: f32[8,1], index: 8, kind: input, shape index: {}]   ;;  %s2964_s9 = inlined_call_operand.vmem [shape: f32[2,8,256], index: 9, kind: output, shape index: {}]  }
   0x1 LB: > { %s1602_s10 = sadd.s32 4294967295, %s1980_s30   ;;  %p1606_p0 = scmp.ge.s32.totalorder %s1980_s30, 1  ;;  %s1980_s30 = sphi %s2036_s30, %s19_s30  }
   0x2   : > { %p286_p1 = scmp.lt.s32.totalorder %s1980_s30, 3 }
   0x4   : > { %p287_p2 = pnand %p1606_p0, %p286_p1 }
   0x5   : > { %v332_v0 = vld [vmem:[%s2956_s1 + $0x8] sm:$0xff] (!%p287_p2)  ;;  %v341_v1 = vld [vmem:[%s2956_s1 + $0x50] sm:$0xff] (!%p287_p2)  ;;  %v331_v2 = vld [vmem:[%s2956_s1] sm:$0xff] (!%p287_p2)  ;;  %p321_p3 = scmp.lt.s32.totalorder (!%p287_p2), %s1602_s10, 1  ;;  %v1982_v7 = vmov (!%p287_p2), 0.0   ;;  %vm434_vm0 = vcmask (!%p287_p2), 392192  }
   0x6   : > { %290 = sbr.rel (%p287_p2) target bundleno = 1062 (0x426), region = 56  ;;  %v1650_v3 = vpack.c.bf16 (!%p287_p2), %v341_v1, %v332_v0  ;;  %v340_v4 = vld [vmem:[%s2956_s1 + $0x48] sm:$0xff] (!%p287_p2)  ;;  %v338_v5 = vld [vmem:[%s2956_s1 + $0x38] sm:$0xff] (!%p287_p2)  ;;  %v347_v6 = vld [vmem:[%s2956_s1 + $0x80] sm:$0xff] (!%p287_p2)  ;;  %502 = vmatprep.mubr.f32.mxu1 (!%p287_p2), %v1982_v7  ;;  %715 = vmatprep.mubr.f32.mxu0 (!%p287_p2), %v1982_v7  ;;  %vm1984_vm1 = vmmov (!%p287_p2), 0   ;;  %vm1061_vm2 = vcmask (!%p287_p2), 64512  }
   0x7   : > { %v1652_v8 = vpack.c.bf16 (!%p287_p2), %v340_v4, %v331_v2  ;;  %v1686_v9 = vpack.c.bf16 (!%p287_p2), %v347_v6, %v338_v5  ;;  %v337_v10 = vld [vmem:[%s2956_s1 + $0x30] sm:$0xff] (!%p287_p2)  ;;  %v346_v11 = vld [vmem:[%s2956_s1 + $0x78] sm:$0xff] (!%p287_p2)  ;;  %v359_v14 = vld [vmem:[%s2956_s1 + $0xe0] sm:$0xff] (!%p287_p2)  ;;  %vm1292_vm3 = vcmask (!%p287_p2), 261120  }
   0x8   : > { %v350_v12 = vld [vmem:[%s2956_s1 + $0x98] sm:$0xff] (!%p287_p2)  ;;  %1651 = vmatprep.subr.bf16.mxu1 (!%p287_p2), %v1650_v3  ;;  %v1688_v13 = vpack.c.bf16 (!%p287_p2), %v346_v11, %v337_v10  ;;  %v349_v15 = vld [vmem:[%s2956_s1 + $0x90] sm:$0xff] (!%p287_p2)  ;;  %v356_v19 = vld [vmem:[%s2956_s1 + $0xc8] sm:$0xff] (!%p287_p2) }
   0x9   : > { %v358_v16 = vld [vmem:[%s2956_s1 + $0xd8] sm:$0xff] (!%p287_p2)  ;;  %1653 = vmatpush1.bf16.msra.mxu1 (!%p287_p2), %v1652_v8  ;;  %1687 = vmatprep.subr.bf16.mxu0 (!%p287_p2), %v1686_v9  ;;  %v1654_v17 = vpack.c.bf16 (!%p287_p2), %v359_v14, %v350_v12  ;;  %v365_v20 = vld [vmem:[%s2956_s1 + $0x110] sm:$0xff] (!%p287_p2)  ;;  %v355_v21 = vld [vmem:[%s2956_s1 + $0xc0] sm:$0xff] (!%p287_p2)  ;;  %v1983_v14 = vmov (!%p287_p2), 0.0|0.0  }
   0xa   : > { %v1656_v18 = vpack.c.bf16 (!%p287_p2), %v358_v16, %v349_v15  ;;  %1689 = vmatpush1.bf16.msra.mxu0 (!%p287_p2), %v1688_v13  ;;  %v1690_v22 = vpack.c.bf16 (!%p287_p2), %v365_v20, %v356_v19  ;;  %v364_v23 = vld [vmem:[%s2956_s1 + $0x108] sm:$0xff] (!%p287_p2)  ;;  %v377_v25 = vld [vmem:[%s2956_s1 + $0x170] sm:$0xff] (!%p287_p2)  ;;  %v367_v28 = vld [vmem:[%s2956_s1 + $0x120] sm:$0xff] (!%p287_p2) }
   0xb   : > { %v368_v24 = vld [vmem:[%s2956_s1 + $0x128] sm:$0xff] (!%p287_p2)  ;;  %1655 = vmatprep.subr.bf16.mxu1 (!%p287_p2), %v1654_v17  ;;  %v1692_v26 = vpack.c.bf16 (!%p287_p2), %v364_v23, %v355_v21  ;;  %v374_v30 = vld [vmem:[%s2956_s1 + $0x158] sm:$0xff] (!%p287_p2)  ;;  %v383_v31 = vld [vmem:[%s2956_s1 + $0x1a0] sm:$0xff] (!%p287_p2) }
   0xc   : > { %v1658_v27 = vpack.c.bf16 (!%p287_p2), %v377_v25, %v368_v24  ;;  %v376_v29 = vld [vmem:[%s2956_s1 + $0x168] sm:$0xff] (!%p287_p2)  ;;  %1691 = vmatprep.subr.bf16.mxu0 (!%p287_p2), %v1690_v22  ;;  %v373_v32 = vld [vmem:[%s2956_s1 + $0x150] sm:$0xff] (!%p287_p2)  ;;  %v382_v33 = vld [vmem:[%s2956_s1 + $0x198] sm:$0xff] (!%p287_p2)  ;;  %v1694_v35 = vpack.c.bf16 (!%p287_p2), %v383_v31, %v374_v30 }
   0xd   : > { %s2966_s10 = smov (!%p321_p3, %s1602_s10), 1  ;;  %1657 = vmatpush1.bf16.msra.mxu1 %v1656_v18  ;;  %v1660_v34 = vpack.c.bf16 %v376_v29, %v367_v28  ;;  %v334_v36 = vld [vmem:[%s2956_s1 + $0x18] sm:$0xff]  ;;  %v343_v37 = vld [vmem:[%s2956_s1 + $0x60] sm:$0xff]  ;;  %v1696_v38 = vpack.c.bf16 %v382_v33, %v373_v32  ;;  %v333_v40 = vld [vmem:[%s2956_s1 + $0x10] sm:$0xff] }
   0xe   : > { %s1607_s15 = sshll.u32 %s2966_s10, 3  ;;  %1693 = vmatpush1.bf16.msra.mxu0 %v1692_v26  ;;  %1659 = vmatprep.subr.bf16.mxu1 %v1658_v27  ;;  %v1662_v39 = vpack.c.bf16 %v343_v37, %v334_v36  ;;  %v342_v41 = vld [vmem:[%s2956_s1 + $0x58] sm:$0xff]  ;;  %v352_v42 = vld [vmem:[%s2956_s1 + $0xa8] sm:$0xff]  ;;  %v361_v43 = vld [vmem:[%s2956_s1 + $0xf0] sm:$0xff]  ;;  %s1627_s17 = sshll.u32 %s2966_s10, 4 }
   0xf   : > { %s324_s28 = scalar_lea.vmem %s2955_s0, %s1607_s15  ;;  %1695 = vmatprep.subr.bf16.mxu0 %v1694_v35  ;;  %v1664_v45 = vpack.c.bf16 %v342_v41, %v333_v40  ;;  %v1666_v46 = vpack.c.bf16 %v361_v43, %v352_v42  ;;  %v351_v47 = vld [vmem:[%s2956_s1 + $0xa0] sm:$0xff]  ;;  %v360_v48 = vld [vmem:[%s2956_s1 + $0xe8] sm:$0xff]  ;;  %v370_v49 = vld [vmem:[%s2956_s1 + $0x138] sm:$0xff]  ;;  %s329_s19 = scalar_lea.vmem %s2964_s9, %s1627_s17 }
  0x10   : > { %v2142_v44 = vld [vmem:[%s324_s28] sm:$0xff]  ;;  %v1668_v51 = vpack.c.bf16 %v360_v48, %v351_v47  ;;  %v369_v53 = vld [vmem:[%s2956_s1 + $0x130] sm:$0xff]  ;;  %v378_v54 = vld [vmem:[%s2956_s1 + $0x178] sm:$0xff] }
  0x11   : > { %1661 = vmatpush1.bf16.msra.mxu1 %v1660_v34  ;;  %v379_v50 = vld [vmem:[%s2956_s1 + $0x180] sm:$0xff]  ;;  %v336_v55 = vld [vmem:[%s2956_s1 + $0x28] sm:$0xff]  ;;  %v345_v56 = vld [vmem:[%s2956_s1 + $0x70] sm:$0xff]  ;;  %v1672_v57 = vpack.c.bf16 %v378_v54, %v369_v53 }
  0x12   : > { %1697 = vmatpush1.bf16.msra.mxu0 %v1696_v38  ;;  %1663 = vmatprep.subr.bf16.mxu1 %v1662_v39  ;;  %v1670_v52 = vpack.c.bf16 %v379_v50, %v370_v49  ;;  %v1674_v58 = vpack.c.bf16 %v345_v56, %v336_v55  ;;  %v335_v59 = vld [vmem:[%s2956_s1 + $0x20] sm:$0xff]  ;;  %v344_v60 = vld [vmem:[%s2956_s1 + $0x68] sm:$0xff]  ;;  %v354_v61 = vld [vmem:[%s2956_s1 + $0xb8] sm:$0xff] }
  0x13   : > { %v363_v62 = vld [vmem:[%s2956_s1 + $0x100] sm:$0xff]  ;;  %v1676_v63 = vpack.c.bf16 %v344_v60, %v335_v59  ;;  %v353_v1 = vld [vmem:[%s2956_s1 + $0xb0] sm:$0xff]  ;;  %v362_v2 = vld [vmem:[%s2956_s1 + $0xf8] sm:$0xff] }
  0x14   : > { %1611 = vmatmul.mubr.msk.f32.vlgmr.msra.gmra.mrb[0].mxu1 %vm434_vm0, %v2142_v44  ;;  %v1678_v0 = vpack.c.bf16 %v363_v62, %v354_v61  ;;  %v372_v3 = vld [vmem:[%s2956_s1 + $0x148] sm:$0xff]  ;;  %v381_v4 = vld [vmem:[%s2956_s1 + $0x190] sm:$0xff]  ;;  %v1680_v5 = vpack.c.bf16 %v362_v2, %v353_v1  ;;  %v371_v8 = vld [vmem:[%s2956_s1 + $0x140] sm:$0xff] }
  0x15   : > { %1665 = vmatpush1.bf16.msra.mxu1 %v1664_v45  ;;  %1614 = vmatmul.mubr.msk.f32.vlgmr.msra.gmra.mrb[0].mxu0 %vm434_vm0, %v2142_v44  ;;  %v1682_v6 = vpack.c.bf16 %v381_v4, %v372_v3  ;;  %v380_v9 = vld [vmem:[%s2956_s1 + $0x188] sm:$0xff]  ;;  %v339_v11 = vld [vmem:[%s2956_s1 + $0x40] sm:$0xff]  ;;  %v357_v15 = vld [vmem:[%s2956_s1 + $0xd0] sm:$0xff] }
  0x16   : > { %1667 = vmatprep.subr.bf16.mxu1 %v1666_v46  ;;  %573 = vmatprep.mubr.f32.mxu1 %v1982_v7  ;;  %v1684_v10 = vpack.c.bf16 %v380_v9, %v371_v8  ;;  %v348_v12 = vld [vmem:[%s2956_s1 + $0x88] sm:$0xff]  ;;  %v366_v16 = vld [vmem:[%s2956_s1 + $0x118] sm:$0xff]  ;;  %v375_v18 = vld [vmem:[%s2956_s1 + $0x160] sm:$0xff] }
  0x17   : > { %1129 = vmatprep.mubr.f32.mxu0 %v1982_v7  ;;  %v1699_v13 = vpack.c.bf16 %v348_v12, %v339_v11  ;;  %v1702_v17 = vpack.c.bf16 %v366_v16, %v357_v15  ;;  %v384_v19 = vld [vmem:[%s2956_s1 + $0x1a8] sm:$0xff]  ;;  %v825_v21 = vld [vmem:[%s2958_s3 + $0x18] sm:$0xff]  ;;  %v822_v24 = vld [vmem:[%s2958_s3] sm:$0xff] }
  0x18   : > { %v823_v20 = vld [vmem:[%s2958_s3 + $0x8] sm:$0xff]  ;;  %v1705_v22 = vpack.c.bf16 %v384_v19, %v375_v18  ;;  %v824_v25 = vld [vmem:[%s2958_s3 + $0x10] sm:$0xff]  ;;  %v829_v27 = vld [vmem:[%s2958_s3 + $0x38] sm:$0xff] }
  0x19   : > { %1669 = vmatpush1.bf16.msra.mxu1 %v1668_v51  ;;  %v1707_v23 = vpack.c.bf16 %v825_v21, %v823_v20  ;;  %v827_v26 = vld [vmem:[%s2958_s3 + $0x28] sm:$0xff]  ;;  %v1709_v28 = vpack.c.bf16 %v824_v25, %v822_v24  ;;  %v826_v30 = vld [vmem:[%s2958_s3 + $0x20] sm:$0xff]  ;;  %v828_v31 = vld [vmem:[%s2958_s3 + $0x30] sm:$0xff] }
  0x1a   : > { %1671 = vmatprep.subr.bf16.mxu1 %v1670_v52  ;;  %v1711_v29 = vpack.c.bf16 %v829_v27, %v827_v26  ;;  %v1713_v32 = vpack.c.bf16 %v828_v31, %v826_v30  ;;  %v831_v33 = vld [vmem:[%s2958_s3 + $0x48] sm:$0xff]  ;;  %v833_v34 = vld [vmem:[%s2958_s3 + $0x58] sm:$0xff]  ;;  %v830_v36 = vld [vmem:[%s2958_s3 + $0x40] sm:$0xff] }
  0x1b   : > { %v1715_v35 = vpack.c.bf16 %v833_v34, %v831_v33  ;;  %v832_v37 = vld [vmem:[%s2958_s3 + $0x50] sm:$0xff]  ;;  %v835_v39 = vld [vmem:[%s2958_s3 + $0x68] sm:$0xff]  ;;  %v837_v40 = vld [vmem:[%s2958_s3 + $0x78] sm:$0xff] }
  0x1c   : > { %v1717_v38 = vpack.c.bf16 %v832_v37, %v830_v36  ;;  %v834_v41 = vld [vmem:[%s2958_s3 + $0x60] sm:$0xff]  ;;  %v1719_v42 = vpack.c.bf16 %v837_v40, %v835_v39  ;;  %v836_v43 = vld [vmem:[%s2958_s3 + $0x70] sm:$0xff]  ;;  %v841_v45 = vld [vmem:[%s2958_s3 + $0x98] sm:$0xff] }
  0x1d   : > { %1673 = vmatpush1.bf16.msra.mxu1 %v1672_v57  ;;  %v1721_v46 = vpack.c.bf16 %v836_v43, %v834_v41  ;;  %v838_v48 = vld [vmem:[%s2958_s3 + $0x80] sm:$0xff]  ;;  %v840_v49 = vld [vmem:[%s2958_s3 + $0x90] sm:$0xff]  ;;  %v843_v51 = vld [vmem:[%s2958_s3 + $0xa8] sm:$0xff] }
  0x1e   : > { %1675 = vmatprep.subr.bf16.mxu1 %v1674_v58  ;;  %v1725_v50 = vpack.c.bf16 %v840_v49, %v838_v48  ;;  %v845_v52 = vld [vmem:[%s2958_s3 + $0xb8] sm:$0xff]  ;;  %v842_v54 = vld [vmem:[%s2958_s3 + $0xa0] sm:$0xff]  ;;  %v844_v55 = vld [vmem:[%s2958_s3 + $0xb0] sm:$0xff] }
  0x1f   : > { %v1727_v53 = vpack.c.bf16 %v845_v52, %v843_v51  ;;  %v1729_v56 = vpack.c.bf16 %v844_v55, %v842_v54  ;;  %v847_v57 = vld [vmem:[%s2958_s3 + $0xc8] sm:$0xff]  ;;  %v849_v58 = vld [vmem:[%s2958_s3 + $0xd8] sm:$0xff]  ;;  %v846_v60 = vld [vmem:[%s2958_s3 + $0xc0] sm:$0xff] }
  0x20   : > { %1612 = vmatmul.mubr.msk.f32.vlgmr.msra.gmra.mrb[2].mxu1 %vm434_vm0, %v2142_v44  ;;  %v1731_v59 = vpack.c.bf16 %v849_v58, %v847_v57  ;;  %v848_v61 = vld [vmem:[%s2958_s3 + $0xd0] sm:$0xff]  ;;  %v850_v2 = vld [vmem:[%s2958_s3 + $0xe0] sm:$0xff]  ;;  %v859_v12 = vld [vmem:[%s2958_s3 + $0x128] sm:$0xff]  ;;  %v389_v57 = vlaneseq }
  0x21   : > { %1677 = vmatpush1.bf16.msra.mxu1 %v1676_v63  ;;  %644 = vmatprep.mubr.f32.mxu1 %v1982_v7  ;;  %v1733_v62 = vpack.c.bf16 %v848_v61, %v846_v60  ;;  %v851_v63 = vld [vmem:[%s2958_s3 + $0xe8] sm:$0xff]  ;;  %v852_v3 = vld [vmem:[%s2958_s3 + $0xf0] sm:$0xff]  ;;  %v854_v9 = vld [vmem:[%s2958_s3 + $0x100] sm:$0xff] }
  0x22   : > { %1679 = vmatprep.subr.bf16.mxu1 %v1678_v0  ;;  %v853_v0 = vld [vmem:[%s2958_s3 + $0xf8] sm:$0xff]  ;;  %v1737_v4 = vpack.c.bf16 %v852_v3, %v850_v2  ;;  %v858_v15 = vld [vmem:[%s2958_s3 + $0x120] sm:$0xff]  ;;  %v860_v16 = vld [vmem:[%s2958_s3 + $0x130] sm:$0xff]  ;;  %v2428_v58 = vshrl.u32 %v389_v57, 7 }
  0x23   : > { %v1735_v1 = vpack.c.bf16 %v853_v0, %v851_v63  ;;  %v863_v18 = vld [vmem:[%s2958_s3 + $0x148] sm:$0xff]  ;;  %v865_v19 = vld [vmem:[%s2958_s3 + $0x158] sm:$0xff]  ;;  %v862_v21 = vld [vmem:[%s2958_s3 + $0x140] sm:$0xff] }
  0x24   : > { %v1747_v20 = vpack.c.bf16 %v865_v19, %v863_v18  ;;  %v867_v24 = vld [vmem:[%s2958_s3 + $0x168] sm:$0xff]  ;;  %v869_v25 = vld [vmem:[%s2958_s3 + $0x178] sm:$0xff]  ;;  %v866_v27 = vld [vmem:[%s2958_s3 + $0x160] sm:$0xff]  ;;  %v415_v60 = vsub.s32 6, %v2428_v58  ;;  %v419_v63 = vsub.s32 7, %v2428_v58 }
  0x25   : > { %1681 = vmatpush1.bf16.msra.mxu1 %v1680_v5  ;;  %v855_v5 = vld [vmem:[%s2958_s3 + $0x108] sm:$0xff]  ;;  %v1751_v26 = vpack.c.bf16 %v869_v25, %v867_v24  ;;  %v873_v31 = vld [vmem:[%s2958_s3 + $0x198] sm:$0xff]  ;;  %v870_v33 = vld [vmem:[%s2958_s3 + $0x180] sm:$0xff] }
  0x26   : > { %1683 = vmatprep.subr.bf16.mxu1 %v1682_v6  ;;  %v857_v6 = vld [vmem:[%s2958_s3 + $0x118] sm:$0xff]  ;;  %v871_v30 = vld [vmem:[%s2958_s3 + $0x188] sm:$0xff]  ;;  %v872_v34 = vld [vmem:[%s2958_s3 + $0x190] sm:$0xff] }
  0x27   : > { %v1739_v8 = vpack.c.bf16 %v857_v6, %v855_v5  ;;  %v875_v36 = vld [vmem:[%s2958_s3 + $0x1a8] sm:$0xff]  ;;  %v877_v37 = vld [vmem:[%s2958_s3 + $0x1b8] sm:$0xff]  ;;  %v876_v40 = vld [vmem:[%s2958_s3 + $0x1b0] sm:$0xff] }
  0x28   : > { %v1759_v39 = vpack.c.bf16 %v877_v37, %v875_v36  ;;  %v879_v41 = vld [vmem:[%s2958_s3 + $0x1c8] sm:$0xff]  ;;  %v885_v49 = vld [vmem:[%s2958_s3 + $0x1f8] sm:$0xff]  ;;  %v882_v51 = vld [vmem:[%s2958_s3 + $0x1e0] sm:$0xff] }
  0x29   : > { %1685 = vmatpush1.bf16.msra.mxu1 %v1684_v10  ;;  %v856_v10 = vld [vmem:[%s2958_s3 + $0x110] sm:$0xff]  ;;  %v883_v48 = vld [vmem:[%s2958_s3 + $0x1e8] sm:$0xff]  ;;  %v889_v55 = vld [vmem:[%s2958_s3 + $0x218] sm:$0xff] }
  0x2a   : > { %1698 = vmatprep.subr.bf16.mxu1 %v1983_v14  ;;  %v1741_v11 = vpack.c.bf16 %v856_v10, %v854_v9  ;;  %v884_v52 = vld [vmem:[%s2958_s3 + $0x1f0] sm:$0xff]  ;;  %v887_v54 = vld [vmem:[%s2958_s3 + $0x208] sm:$0xff]  ;;  %v385_v61 = vld [vmem:[%s2957_s2] sm:$0xff] }
  0x2b   : > { %v420_v3 = vrot.slane %v385_v61, %v419_v63 }
  0x2c   : > { %1613 = vmatmul.mubr.msk.f32.vlgmr.msra.gmra.mrb[4].mxu1 %vm434_vm0, %v2142_v44 }
  0x2d   : > { %1700 = vmatpush3.bf16.msra.mxu1 %v1699_v13  ;;  %1647 = vmatprep.mubr.msk.f32.mxu1 %vm1984_vm1, %v1982_v7  ;;  %v861_v13 = vld [vmem:[%s2958_s3 + $0x138] sm:$0xff] }
  0x2e   : > { %1701 = vmatprep.subr.bf16.mxu1 %v1983_v14 }
  0x31   : > { %1703 = vmatpush3.bf16.msra.mxu1 %v1702_v17  ;;  %v1745_v17 = vpack.c.bf16 %v860_v16, %v858_v15  ;;  %v403_v15 = vsub.s32 3, %v2428_v58 }
  0x32   : > { %1704 = vmatprep.subr.bf16.mxu1 %v1983_v14  ;;  %v1743_v14 = vpack.c.bf16 %v861_v13, %v859_v12 }
  0x33   : > { %v404_v16 = vrot.slane %v385_v61, %v403_v15 }
  0x35   : > { %1706 = vmatpush3.bf16.msra.mxu1 %v1705_v22  ;;  %v864_v22 = vld [vmem:[%s2958_s3 + $0x150] sm:$0xff] }
  0x36   : > { %1708 = vmatprep.subr.bf16.mxu1 %v1707_v23  ;;  %v1749_v23 = vpack.c.bf16 %v864_v22, %v862_v21  ;;  %v407_v21 = vsub.s32 4, %v2428_v58  ;;  %v411_v22 = vsub.s32 5, %v2428_v58 }
  0x38   : > { %1648 = vmatmul.mubr.msk.f32.vlgmr.msra.gmra.mrb[6].mxu1 %vm434_vm0, %v2142_v44  ;;  %v839_v44 = vld [vmem:[%s2958_s3 + $0x88] sm:$0xff]  ;;  %v412_v24 = vrot.slane %v385_v61, %v411_v22 }
  0x39   : > { %1710 = vmatpush1.bf16.msra.mxu1 %v1709_v28  ;;  %v1723_v47 = vpack.c.bf16 %v841_v45, %v839_v44  ;;  %v868_v28 = vld [vmem:[%s2958_s3 + $0x170] sm:$0xff]  ;;  %v878_v45 = vld [vmem:[%s2958_s3 + $0x1c0] sm:$0xff] }
  0x3a   : > { %1712 = vmatprep.subr.bf16.mxu1 %v1711_v29  ;;  %v1753_v29 = vpack.c.bf16 %v868_v28, %v866_v27 }
  0x3d   : > { %1714 = vmatpush1.bf16.msra.mxu1 %v1713_v32  ;;  %v1755_v32 = vpack.c.bf16 %v873_v31, %v871_v30 }
  0x3e   : > { %1716 = vmatprep.subr.bf16.mxu1 %v1715_v35  ;;  %v1757_v35 = vpack.c.bf16 %v872_v34, %v870_v33 }
  0x41   : > { %1718 = vmatpush1.bf16.msra.mxu1 %v1717_v38  ;;  %v874_v38 = vld [vmem:[%s2958_s3 + $0x1a0] sm:$0xff] }
  0x42   : > { %1720 = vmatprep.subr.bf16.mxu1 %v1719_v42  ;;  %v881_v42 = vld [vmem:[%s2958_s3 + $0x1d8] sm:$0xff]  ;;  %v1761_v43 = vpack.c.bf16 %v876_v40, %v874_v38 }
  0x43   : > { %v1763_v44 = vpack.c.bf16 %v881_v42, %v879_v41  ;;  %v399_v41 = vsub.s32 2, %v2428_v58 }
  0x45   : > { %1722 = vmatpush1.bf16.msra.mxu1 %v1721_v46  ;;  %v880_v46 = vld [vmem:[%s2958_s3 + $0x1d0] sm:$0xff]  ;;  %v400_v42 = vrot.slane %v385_v61, %v399_v41 }
  0x46   : > { %1724 = vmatprep.subr.bf16.mxu1 %v1723_v47  ;;  %v1765_v47 = vpack.c.bf16 %v880_v46, %v878_v45 }
  0x49   : > { %1726 = vmatpush1.bf16.msra.mxu1 %v1725_v50  ;;  %v1767_v50 = vpack.c.bf16 %v885_v49, %v883_v48 }
  0x4a   : > { %1728 = vmatprep.subr.bf16.mxu1 %v1727_v53  ;;  %v1769_v53 = vpack.c.bf16 %v884_v52, %v882_v51  ;;  %v886_v51 = vld [vmem:[%s2958_s3 + $0x200] sm:$0xff]  ;;  %v888_v52 = vld [vmem:[%s2958_s3 + $0x210] sm:$0xff] }
  0x4d   : > { %1730 = vmatpush1.bf16.msra.mxu1 %v1729_v56  ;;  %v1771_v56 = vpack.c.bf16 %v889_v55, %v887_v54  ;;  %v891_v54 = vld [vmem:[%s2958_s3 + $0x228] sm:$0xff]  ;;  %v893_v55 = vld [vmem:[%s2958_s3 + $0x238] sm:$0xff] }
  0x4e   : > { %1732 = vmatprep.subr.bf16.mxu1 %v1731_v59  ;;  %v391_v59 = vsub.s32 0, %v2428_v58  ;;  %v1775_v63 = vpack.c.bf16 %v893_v55, %v891_v54  ;;  %v1060_v54 = vld [vmem:[%s2959_s4] sm:$0xff] }
  0x50   : > { %v392_v0 = vrot.slane %v385_v61, %v391_v59 }
  0x51   : > { %1734 = vmatpush1.bf16.msra.mxu1 %v1733_v62  ;;  %v395_v62 = vsub.s32 1, %v2428_v58 }
  0x52   : > { %1736 = vmatprep.subr.bf16.mxu1 %v1735_v1  ;;  %v416_v1 = vrot.slane %v385_v61, %v415_v60  ;;  %v1773_v60 = vpack.c.bf16 %v888_v52, %v886_v51 }
  0x53   : > { %v396_v2 = vrot.slane %v385_v61, %v395_v62 }
  0x55   : > { %1738 = vmatpush1.bf16.msra.mxu1 %v1737_v4  ;;  %v1923_v4 = vadd.f32 %v416_v1, %v392_v0  ;;  %v1927_v5 = vadd.f32 %v420_v3, %v396_v2  ;;  %v890_v0 = vld [vmem:[%s2958_s3 + $0x220] sm:$0xff]  ;;  %v892_v1 = vld [vmem:[%s2958_s3 + $0x230] sm:$0xff]  ;;  %v895_v2 = vld [vmem:[%s2958_s3 + $0x248] sm:$0xff] }
  0x56   : > { %1740 = vmatprep.subr.bf16.mxu1 %v1739_v8  ;;  %v897_v3 = vld [vmem:[%s2958_s3 + $0x258] sm:$0xff] }
  0x59   : > { %1742 = vmatpush1.bf16.msra.mxu1 %v1741_v11 }
  0x5a   : > { %1744 = vmatprep.subr.bf16.mxu1 %v1743_v14 }
  0x5d   : > { %1746 = vmatpush1.bf16.msra.mxu1 %v1745_v17 }
  0x5e   : > { %1748 = vmatprep.subr.bf16.mxu1 %v1747_v20 }
  0x61   : > { %1750 = vmatpush1.bf16.msra.mxu1 %v1749_v23  ;;  %v408_v23 = vrot.slane %v385_v61, %v407_v21 }
  0x62   : > { %1752 = vmatprep.subr.bf16.mxu1 %v1751_v26 }
  0x65   : > { %1754 = vmatpush1.bf16.msra.mxu1 %v1753_v29 }
  0x66   : > { %1756 = vmatprep.subr.bf16.mxu1 %v1755_v32 }
  0x69   : > { %1758 = vmatpush1.bf16.msra.mxu1 %v1757_v35 }
  0x6a   : > { %1760 = vmatprep.subr.bf16.mxu1 %v1759_v39 }
  0x6d   : > { %1762 = vmatpush1.bf16.msra.mxu1 %v1761_v43  ;;  %v1610_v43 = vld [vmem:[%s2957_s2 + $0x8] ss:$0 sm:$0xff] }
  0x6e   : > { %1764 = vmatprep.subr.bf16.mxu1 %v1763_v44 }
  0x71   : > { %1766 = vmatpush1.bf16.msra.mxu1 %v1765_v47 }
  0x72   : > { %1768 = vmatprep.subr.bf16.mxu1 %v1767_v50 }
  0x75   : > { %1770 = vmatpush1.bf16.msra.mxu1 %v1769_v53 }
  0x76   : > { %1772 = vmatprep.subr.bf16.mxu1 %v1771_v56 }
  0xe7   : > { %v504_v6 = vpop.f32.mrb[0].mxu1 }
  0xe8   : > { %v1924_v8 = vadd.f32 %v1923_v4, %v504_v6  ;;  %v506_v9 = vpop.f32.mrb[1].mxu1  ;;  %v717_v10 = vpop.f32.mrb[0].mxu0  ;;  %v1777_v4 = vpack.c.bf16 %v892_v1, %v890_v0  ;;  %v894_v6 = vld [vmem:[%s2958_s3 + $0x240] sm:$0xff] }
  0xe9   : > { %v1928_v11 = vadd.f32 %v1927_v5, %v506_v9  ;;  %v719_v12 = vpop.f32.mrb[1].mxu0  ;;  %v1779_v5 = vpack.c.bf16 %v897_v3, %v895_v2  ;;  %v899_v9 = vld [vmem:[%s2958_s3 + $0x268] sm:$0xff]  ;;  %v1164_v2 = vld [vmem:[%s2960_s5 + $0xc0] sm:$0xff]  ;;  %v1170_v3 = vld [vmem:[%s2960_s5 + $0xf0] sm:$0xff] }
  0xea   : > { %v1925_v13 = vadd.f32 %v1924_v8, %v717_v10  ;;  %v896_v8 = vld [vmem:[%s2958_s3 + $0x250] sm:$0xff]  ;;  %v901_v10 = vld [vmem:[%s2958_s3 + $0x278] sm:$0xff] }
  0xeb   : > { %v1929_v14 = vadd.f32 %v1928_v11, %v719_v12  ;;  %v1783_v11 = vpack.c.bf16 %v901_v10, %v899_v9  ;;  %v898_v12 = vld [vmem:[%s2958_s3 + $0x260] sm:$0xff]  ;;  %v1182_v10 = vld [vmem:[%s2960_s5 + $0x150] sm:$0xff] }
  0xec   : > { %v1176_v9 = vld [vmem:[%s2960_s5 + $0x120] sm:$0xff] }
  0xf3   : > { %v575_v17 = vpop.f32.mrb[2].mxu1 }
  0xf4   : > { %v577_v18 = vpop.f32.mrb[3].mxu1  ;;  %v576_v45 = vadd.f32 %v575_v17, %v400_v42 }
  0xf5   : > { %v578_v19 = vadd.f32 %v577_v18, %v404_v16  ;;  %v905_v16 = vld [vmem:[%s2958_s3 + $0x298] sm:$0xff] }
  0xf7   : > { %v1616_v20 = vmul.f32 -1.442695, %v578_v19  ;;  %v902_v19 = vld [vmem:[%s2958_s3 + $0x280] sm:$0xff] }
  0xf9   : > { %1954 = vpow2.f32 %v1616_v20  ;;  %v904_v20 = vld [vmem:[%s2958_s3 + $0x290] sm:$0xff] }
  0xff   : > { %v646_v25 = vpop.f32.mrb[4].mxu1 }
 0x100   : > { %v647_v26 = vadd.f32 %v646_v25, %v408_v23  ;;  %v648_v27 = vpop.f32.mrb[5].mxu1  ;;  %v907_v23 = vld [vmem:[%s2958_s3 + $0x2a8] sm:$0xff]  ;;  %v1789_v25 = vpack.c.bf16 %v904_v20, %v902_v19 }
 0x101   : > { %v649_v28 = vadd.f32 %v648_v27, %v412_v24  ;;  %v909_v24 = vld [vmem:[%s2958_s3 + $0x2b8] sm:$0xff]  ;;  %v906_v27 = vld [vmem:[%s2958_s3 + $0x2a0] sm:$0xff] }
 0x102   : > { %v1617_v29 = vmul.f32 -1.442695, %v647_v26  ;;  %v1791_v26 = vpack.c.bf16 %v909_v24, %v907_v23  ;;  %v1200_v23 = vld [vmem:[%s2960_s5 + $0x1e0] sm:$0xff]  ;;  %v1206_v24 = vld [vmem:[%s2960_s5 + $0x210] sm:$0xff] }
 0x103   : > { %v1955_v30 = vpop.eup %1954  ;;  %v1618_v31 = vmul.f32 -1.442695, %v649_v28  ;;  %v908_v28 = vld [vmem:[%s2958_s3 + $0x2b0] sm:$0xff] }
 0x104   : > { %v801_v32 = vadd.f32 1.0, %v1955_v30  ;;  %1956 = vpow2.f32 %v1617_v29  ;;  %v911_v29 = vld [vmem:[%s2958_s3 + $0x2c8] sm:$0xff]  ;;  %v913_v30 = vld [vmem:[%s2958_s3 + $0x2d8] sm:$0xff] }
 0x105   : > { %1958 = vpow2.f32 %v1618_v31  ;;  %v1793_v31 = vpack.c.bf16 %v908_v28, %v906_v27  ;;  %v1825_v27 = vpack.c.bf16 %v1206_v24, %v1200_v23  ;;  %v1178_v23 = vld [vmem:[%s2960_s5 + $0x130] sm:$0xff]  ;;  %v1184_v24 = vld [vmem:[%s2960_s5 + $0x160] sm:$0xff] }
 0x106   : > { %1960 = vrcp.f32 %v801_v32  ;;  %v1795_v32 = vpack.c.bf16 %v913_v30, %v911_v29  ;;  %v1212_v29 = vld [vmem:[%s2960_s5 + $0x240] sm:$0xff]  ;;  %v1218_v30 = vld [vmem:[%s2960_s5 + $0x270] sm:$0xff] }
 0x10b   : > { %v788_v33 = vpop.f32.mrb[6].mxu1 }
 0x10c   : > { %v1649_v34 = vpop.f32.mrb[7].mxu1  ;;  %v789_v46 = vadd.f32 %v1610_v43, %v788_v33  ;;  %v910_v33 = vld [vmem:[%s2958_s3 + $0x2c0] sm:$0xff] }
 0x10d   : > { %v912_v34 = vld [vmem:[%s2958_s3 + $0x2d0] sm:$0xff] }
 0x10e   : > { %v1957_v35 = vpop.eup %1956 }
 0x10f   : > { %v1959_v36 = vpop.eup %1958  ;;  %v802_v37 = vadd.f32 1.0, %v1957_v35  ;;  %v915_v35 = vld [vmem:[%s2958_s3 + $0x2e8] sm:$0xff] }
 0x110   : > { %v1961_v38 = vpop.eup %1960  ;;  %v803_v39 = vadd.f32 1.0, %v1959_v36  ;;  %v917_v36 = vld [vmem:[%s2958_s3 + $0x2f8] sm:$0xff] }
 0x111   : > { %1962 = vrcp.f32 %v802_v37  ;;  %v1926_v40 = vadd.f32 %v1961_v38, %v1925_v13  ;;  %v900_v13 = vld [vmem:[%s2958_s3 + $0x270] sm:$0xff]  ;;  %v1797_v37 = vpack.c.bf16 %v912_v34, %v910_v33  ;;  %v1799_v38 = vpack.c.bf16 %v917_v36, %v915_v35  ;;  %v1224_v35 = vld [vmem:[%s2960_s5 + $0x2a0] sm:$0xff] }
 0x112   : > { %1964 = vrcp.f32 %v803_v39  ;;  %v1785_v17 = vpack.c.bf16 %v900_v13, %v898_v12  ;;  %v914_v39 = vld [vmem:[%s2958_s3 + $0x2e0] sm:$0xff]  ;;  %v1817_v12 = vpack.c.bf16 %v1182_v10, %v1176_v9  ;;  %v1829_v33 = vpack.c.bf16 %v1218_v30, %v1212_v29  ;;  %v1230_v36 = vld [vmem:[%s2960_s5 + $0x2d0] sm:$0xff] }
 0x113   : > { %v816_v50 = vmul.f32 0.01, %v1926_v40  ;;  %v1154_v9 = vld [vmem:[%s2960_s5 + $0x70] sm:$0xff]  ;;  %v1160_v10 = vld [vmem:[%s2960_s5 + $0xa0] sm:$0xff] }
 0x114   : > { %v1190_v29 = vld [vmem:[%s2960_s5 + $0x190] sm:$0xff]  ;;  %v1196_v30 = vld [vmem:[%s2960_s5 + $0x1c0] sm:$0xff] }
 0x115   : > { %v819_v61 = vmax.f32 %v1926_v40, %v816_v50  ;;  %v916_v40 = vld [vmem:[%s2958_s3 + $0x2f0] sm:$0xff]  ;;  %v1159_v50 = vld [vmem:[%s2960_s5 + $0x98] sm:$0xff] }
 0x116   : > { %v1801_v42 = vpack.c.bf16 %v916_v40, %v914_v39  ;;  %v1833_v39 = vpack.c.bf16 %v1230_v36, %v1224_v35  ;;  %v1202_v35 = vld [vmem:[%s2960_s5 + $0x1f0] sm:$0xff]  ;;  %v1208_v36 = vld [vmem:[%s2960_s5 + $0x220] sm:$0xff] }
 0x11b   : > { %v1963_v44 = vpop.eup %1962 }
 0x11c   : > { %v1965_v47 = vpop.eup %1964  ;;  %v1930_v48 = vadd.f32 %v1963_v44, %v1929_v14  ;;  %v903_v14 = vld [vmem:[%s2958_s3 + $0x288] sm:$0xff] }
 0x11d   : > { %v812_v49 = vadd.f32 %v1965_v47, %v576_v45  ;;  %v1787_v18 = vpack.c.bf16 %v905_v16, %v903_v14  ;;  %v1141_v45 = vld [vmem:[%s2960_s5 + $0x8] sm:$0xff]  ;;  %v1140_v47 = vld [vmem:[%s2960_s5] sm:$0xff]  ;;  %v1194_v16 = vld [vmem:[%s2960_s5 + $0x1b0] sm:$0xff] }
 0x11e   : > { %v817_v53 = vmul.f32 0.01, %v1930_v48  ;;  %v1188_v14 = vld [vmem:[%s2960_s5 + $0x180] sm:$0xff] }
 0x11f   : > { %v2468_v56 = vadd.f32 %v812_v49, %v789_v46  ;;  %v1147_v46 = vld [vmem:[%s2960_s5 + $0x38] sm:$0xff]  ;;  %v1153_v49 = vld [vmem:[%s2960_s5 + $0x68] sm:$0xff]  ;;  %v1821_v19 = vpack.c.bf16 %v1194_v16, %v1188_v14  ;;  %v1166_v14 = vld [vmem:[%s2960_s5 + $0xd0] sm:$0xff] }
 0x120   : > { %v820_v57 = vmax.f32 %v1930_v48, %v817_v53  ;;  %v1146_v48 = vld [vmem:[%s2960_s5 + $0x30] sm:$0xff]  ;;  %v1803_v52 = vpack.c.bf16 %v1147_v46, %v1141_v45  ;;  %v1249_v45 = vld [vmem:[%s2960_s5 + $0x368] sm:$0xff]  ;;  %v1255_v46 = vld [vmem:[%s2960_s5 + $0x398] sm:$0xff] }
 0x121   : > { %v818_v43 = vmul.f32 0.01, %v2468_v56  ;;  %v1805_v55 = vpack.c.bf16 %v1146_v48, %v1140_v47  ;;  %v1839_v47 = vpack.c.bf16 %v1255_v46, %v1249_v45  ;;  %v1248_v48 = vld [vmem:[%s2960_s5 + $0x360] sm:$0xff]  ;;  %v1233_v45 = vld [vmem:[%s2960_s5 + $0x2e8] sm:$0xff] }
 0x122   : > { %982 = vmatprep.mubr.f32.mxu1 %v820_v57  ;;  %v1152_v57 = vld [vmem:[%s2960_s5 + $0x60] sm:$0xff] }
 0x123   : > { %983 = vmatmul.mubr.f32.vlgmr.msra.gmra.mrb[8].mxu1 %v819_v61  ;;  %v821_v44 = vmax.f32 %v2468_v56, %v818_v43  ;;  %v1807_v56 = vpack.c.bf16 %v1159_v50, %v1153_v49  ;;  %v1165_v61 = vld [vmem:[%s2960_s5 + $0xc8] sm:$0xff]  ;;  %v1242_v43 = vld [vmem:[%s2960_s5 + $0x330] sm:$0xff]  ;;  %v1172_v16 = vld [vmem:[%s2960_s5 + $0x100] sm:$0xff] }
 0x124   : > { %1774 = vmatpush1.bf16.msra.mxu1 %v1773_v60  ;;  %1053 = vmatprep.mubr.f32.mxu1 %v1982_v7  ;;  %v1781_v7 = vpack.c.bf16 %v896_v8, %v894_v6  ;;  %v1158_v60 = vld [vmem:[%s2960_s5 + $0x90] sm:$0xff]  ;;  %v1813_v6 = vpack.c.bf16 %v1170_v3, %v1164_v2  ;;  %v1155_v2 = vld [vmem:[%s2960_s5 + $0x78] sm:$0xff]  ;;  %v1161_v3 = vld [vmem:[%s2960_s5 + $0xa8] sm:$0xff] }
 0x125   : > { %1776 = vmatprep.subr.bf16.mxu1 %v1775_v63  ;;  %v1171_v63 = vld [vmem:[%s2960_s5 + $0xf8] sm:$0xff]  ;;  %v1809_v0 = vpack.c.bf16 %v1158_v60, %v1152_v57  ;;  %v1254_v49 = vld [vmem:[%s2960_s5 + $0x390] sm:$0xff] }
 0x126   : > { %v1811_v1 = vpack.c.bf16 %v1171_v63, %v1165_v61  ;;  %v1841_v50 = vpack.c.bf16 %v1254_v49, %v1248_v48  ;;  %v1142_v63 = vld [vmem:[%s2960_s5 + $0x10] sm:$0xff]  ;;  %v1232_v49 = vld [vmem:[%s2960_s5 + $0x2e0] sm:$0xff] }
 0x127   : > { %v1226_v48 = vld [vmem:[%s2960_s5 + $0x2b0] sm:$0xff] }
 0x128   : > { %1778 = vmatpush1.bf16.msra.mxu1 %v1777_v4  ;;  %v1177_v4 = vld [vmem:[%s2960_s5 + $0x128] sm:$0xff] }
 0x129   : > { %1780 = vmatprep.subr.bf16.mxu1 %v1779_v5  ;;  %v1183_v5 = vld [vmem:[%s2960_s5 + $0x158] sm:$0xff] }
 0x12a   : > { %v1815_v8 = vpack.c.bf16 %v1183_v5, %v1177_v4 }
 0x12c   : > { %1782 = vmatpush1.bf16.msra.mxu1 %v1781_v7  ;;  %v1189_v7 = vld [vmem:[%s2960_s5 + $0x188] sm:$0xff] }
 0x12d   : > { %1784 = vmatprep.subr.bf16.mxu1 %v1783_v11  ;;  %v1195_v11 = vld [vmem:[%s2960_s5 + $0x1b8] sm:$0xff] }
 0x12e   : > { %v1819_v13 = vpack.c.bf16 %v1195_v11, %v1189_v7  ;;  %v1167_v7 = vld [vmem:[%s2960_s5 + $0xd8] sm:$0xff]  ;;  %v1173_v11 = vld [vmem:[%s2960_s5 + $0x108] sm:$0xff] }
 0x130   : > { %1786 = vmatpush1.bf16.msra.mxu1 %v1785_v17  ;;  %v1201_v17 = vld [vmem:[%s2960_s5 + $0x1e8] sm:$0xff] }
 0x131   : > { %1788 = vmatprep.subr.bf16.mxu1 %v1787_v18  ;;  %v1207_v18 = vld [vmem:[%s2960_s5 + $0x218] sm:$0xff] }
 0x132   : > { %v1823_v20 = vpack.c.bf16 %v1207_v18, %v1201_v17  ;;  %v1179_v17 = vld [vmem:[%s2960_s5 + $0x138] sm:$0xff]  ;;  %v1185_v18 = vld [vmem:[%s2960_s5 + $0x168] sm:$0xff] }
 0x134   : > { %1790 = vmatpush1.bf16.msra.mxu1 %v1789_v25  ;;  %v1213_v25 = vld [vmem:[%s2960_s5 + $0x248] sm:$0xff] }
 0x135   : > { %1792 = vmatprep.subr.bf16.mxu1 %v1791_v26  ;;  %v1219_v26 = vld [vmem:[%s2960_s5 + $0x278] sm:$0xff] }
 0x136   : > { %v1827_v28 = vpack.c.bf16 %v1219_v26, %v1213_v25  ;;  %v1191_v25 = vld [vmem:[%s2960_s5 + $0x198] sm:$0xff]  ;;  %v1197_v26 = vld [vmem:[%s2960_s5 + $0x1c8] sm:$0xff] }
 0x138   : > { %1794 = vmatpush1.bf16.msra.mxu1 %v1793_v31  ;;  %v1225_v31 = vld [vmem:[%s2960_s5 + $0x2a8] sm:$0xff] }
 0x139   : > { %1796 = vmatprep.subr.bf16.mxu1 %v1795_v32  ;;  %v1231_v32 = vld [vmem:[%s2960_s5 + $0x2d8] sm:$0xff] }
 0x13a   : > { %v1831_v34 = vpack.c.bf16 %v1231_v32, %v1225_v31  ;;  %v1203_v31 = vld [vmem:[%s2960_s5 + $0x1f8] sm:$0xff]  ;;  %v1209_v32 = vld [vmem:[%s2960_s5 + $0x228] sm:$0xff] }
 0x13c   : > { %1798 = vmatpush1.bf16.msra.mxu1 %v1797_v37  ;;  %v1237_v37 = vld [vmem:[%s2960_s5 + $0x308] sm:$0xff] }
 0x13d   : > { %1800 = vmatprep.subr.bf16.mxu1 %v1799_v38  ;;  %v1243_v38 = vld [vmem:[%s2960_s5 + $0x338] sm:$0xff] }
 0x13e   : > { %v1835_v40 = vpack.c.bf16 %v1243_v38, %v1237_v37  ;;  %v1215_v37 = vld [vmem:[%s2960_s5 + $0x258] sm:$0xff]  ;;  %v1221_v38 = vld [vmem:[%s2960_s5 + $0x288] sm:$0xff] }
 0x140   : > { %1802 = vmatpush1.bf16.msra.mxu1 %v1801_v42  ;;  %v1236_v42 = vld [vmem:[%s2960_s5 + $0x300] sm:$0xff] }
 0x143   : > { %1054 = vmatmul.mubr.f32.vlgmr.msra.gmra.mrb[8].mxu1 %v821_v44  ;;  %v1837_v44 = vpack.c.bf16 %v1242_v43, %v1236_v42  ;;  %v1214_v42 = vld [vmem:[%s2960_s5 + $0x250] sm:$0xff]  ;;  %v1220_v43 = vld [vmem:[%s2960_s5 + $0x280] sm:$0xff] }
 0x144   : > { %v1869_v46 = vpack.c.bf16 %v1220_v43, %v1214_v42  ;;  %v1217_v42 = vld [vmem:[%s2960_s5 + $0x268] sm:$0xff]  ;;  %v1223_v43 = vld [vmem:[%s2960_s5 + $0x298] sm:$0xff] }
 0x216   : > { %v1055_v51 = vpop.f32.mrb[8].mxu1 }
 0x217   : > { %v1057_v53 = vpop.f32.mrb[9].mxu1 }
 0x218   : > { %1065 = vmatprep.subr.mxu0 %v1057_v53 }
 0x219   : > { %1066 = vmatpush1.msra.mxu0 %v1055_v51  ;;  %v1143_v51 = vld [vmem:[%s2960_s5 + $0x18] sm:$0xff] }
 0x21a   : > { %1619 = vmatmul.mubr.msk.f32.vlgmr.msra.gmra.mrb[2].mxu0 %vm1061_vm2, %v1060_v54  ;;  %1804 = vmatprep.subr.bf16.mxu0 %v1803_v52  ;;  %v1149_v52 = vld [vmem:[%s2960_s5 + $0x48] sm:$0xff]  ;;  %v1529_v54 = vld [vmem:[%s2962_s7] sm:$0xff] }
 0x21b   : > { %1806 = vmatpush1.bf16.msra.mxu0 %v1805_v55  ;;  %v1843_v53 = vpack.c.bf16 %v1149_v52, %v1143_v51  ;;  %v1985_v55 = vmov 0   ;;  %v1245_v51 = vld [vmem:[%s2960_s5 + $0x348] sm:$0xff]  ;;  %v1873_v52 = vpack.c.bf16 %v1232_v49, %v1226_v48  ;;  %v1235_v49 = vld [vmem:[%s2960_s5 + $0x2f8] sm:$0xff] }
 0x21c   : > { %1808 = vmatprep.subr.bf16.mxu0 %v1807_v56  ;;  %1953 = vset.pattern.permute.xlu0 %v1985_v55  ;;  %v1537_v56 = vld [vmem:[%s2963_s8] sm:$0xff]  ;;  %v1229_v48 = vld [vmem:[%s2960_s5 + $0x2c8] sm:$0xff] }
 0x21d   : > { %1532 = vperm.xlu0 %1953, %v1529_v54   ;;  %v1238_v54 = vld [vmem:[%s2960_s5 + $0x310] sm:$0xff]  ;;  %v1244_v55 = vld [vmem:[%s2960_s5 + $0x340] sm:$0xff] }
 0x21f   : > { %1810 = vmatpush1.bf16.msra.mxu0 %v1809_v0  ;;  %v1148_v0 = vld [vmem:[%s2960_s5 + $0x40] sm:$0xff] }
 0x220   : > { %1812 = vmatprep.subr.bf16.mxu0 %v1811_v1  ;;  %v1845_v5 = vpack.c.bf16 %v1148_v0, %v1142_v63  ;;  %v1250_v63 = vld [vmem:[%s2960_s5 + $0x370] sm:$0xff]  ;;  %v1256_v0 = vld [vmem:[%s2960_s5 + $0x3a0] sm:$0xff] }
 0x221   : > { %1540 = vperm.xlu0 %1953, %v1537_v56   ;;  %v1251_v56 = vld [vmem:[%s2960_s5 + $0x378] sm:$0xff] }
 0x223   : > { %1814 = vmatpush1.bf16.msra.mxu0 %v1813_v6 }
 0x224   : > { %1816 = vmatprep.subr.bf16.mxu0 %v1815_v8  ;;  %v1847_v8 = vpack.c.bf16 %v1161_v3, %v1155_v2  ;;  %v1151_v2 = vld [vmem:[%s2960_s5 + $0x58] sm:$0xff]  ;;  %v1881_v3 = vpack.c.bf16 %v1256_v0, %v1250_v63  ;;  %v1253_v63 = vld [vmem:[%s2960_s5 + $0x388] sm:$0xff] }
 0x225   : > { %v1259_v0 = vld [vmem:[%s2960_s5 + $0x3b8] sm:$0xff] }
 0x227   : > { %1818 = vmatpush1.bf16.msra.mxu0 %v1817_v12  ;;  %v1849_v12 = vpack.c.bf16 %v1160_v10, %v1154_v9  ;;  %v1150_v9 = vld [vmem:[%s2960_s5 + $0x50] sm:$0xff]  ;;  %v1157_v10 = vld [vmem:[%s2960_s5 + $0x88] sm:$0xff] }
 0x228   : > { %1820 = vmatprep.subr.bf16.mxu0 %v1819_v13  ;;  %v1851_v13 = vpack.c.bf16 %v1173_v11, %v1167_v7  ;;  %v1163_v7 = vld [vmem:[%s2960_s5 + $0xb8] sm:$0xff] }
 0x22b   : > { %1822 = vmatpush1.bf16.msra.mxu0 %v1821_v19  ;;  %v1853_v19 = vpack.c.bf16 %v1172_v16, %v1166_v14  ;;  %v1162_v14 = vld [vmem:[%s2960_s5 + $0xb0] sm:$0xff]  ;;  %v1169_v16 = vld [vmem:[%s2960_s5 + $0xe8] sm:$0xff] }
 0x22c   : > { %1824 = vmatprep.subr.bf16.mxu0 %v1823_v20  ;;  %v1855_v20 = vpack.c.bf16 %v1185_v18, %v1179_v17  ;;  %v1175_v17 = vld [vmem:[%s2960_s5 + $0x118] sm:$0xff] }
 0x22f   : > { %1826 = vmatpush1.bf16.msra.mxu0 %v1825_v27  ;;  %v1857_v27 = vpack.c.bf16 %v1184_v24, %v1178_v23  ;;  %v1174_v23 = vld [vmem:[%s2960_s5 + $0x110] sm:$0xff]  ;;  %v1181_v24 = vld [vmem:[%s2960_s5 + $0x148] sm:$0xff] }
 0x230   : > { %1828 = vmatprep.subr.bf16.mxu0 %v1827_v28  ;;  %v1859_v28 = vpack.c.bf16 %v1197_v26, %v1191_v25  ;;  %v1187_v25 = vld [vmem:[%s2960_s5 + $0x178] sm:$0xff] }
 0x231   : > { %v1895_v26 = vpack.c.bf16 %v1187_v25, %v1181_v24 }
 0x233   : > { %1830 = vmatpush1.bf16.msra.mxu0 %v1829_v33  ;;  %v1861_v33 = vpack.c.bf16 %v1196_v30, %v1190_v29  ;;  %v1193_v29 = vld [vmem:[%s2960_s5 + $0x1a8] sm:$0xff]  ;;  %v1199_v30 = vld [vmem:[%s2960_s5 + $0x1d8] sm:$0xff] }
 0x234   : > { %1832 = vmatprep.subr.bf16.mxu0 %v1831_v34  ;;  %v1863_v34 = vpack.c.bf16 %v1209_v32, %v1203_v31  ;;  %v1899_v32 = vpack.c.bf16 %v1199_v30, %v1193_v29 }
 0x237   : > { %1834 = vmatpush1.bf16.msra.mxu0 %v1833_v39  ;;  %v1865_v39 = vpack.c.bf16 %v1208_v36, %v1202_v35  ;;  %v1205_v35 = vld [vmem:[%s2960_s5 + $0x208] sm:$0xff]  ;;  %v1211_v36 = vld [vmem:[%s2960_s5 + $0x238] sm:$0xff] }
 0x238   : > { %1836 = vmatprep.subr.bf16.mxu0 %v1835_v40  ;;  %v1867_v40 = vpack.c.bf16 %v1221_v38, %v1215_v37  ;;  %v1903_v38 = vpack.c.bf16 %v1211_v36, %v1205_v35 }
 0x23b   : > { %1838 = vmatpush1.bf16.msra.mxu0 %v1837_v44  ;;  %v1227_v44 = vld [vmem:[%s2960_s5 + $0x2b8] sm:$0xff] }
 0x23c   : > { %1840 = vmatprep.subr.bf16.mxu0 %v1839_v47  ;;  %v1871_v47 = vpack.c.bf16 %v1233_v45, %v1227_v44  ;;  %v1907_v45 = vpack.c.bf16 %v1223_v43, %v1217_v42 }
 0x23f   : > { %1842 = vmatpush1.bf16.msra.mxu0 %v1841_v50  ;;  %v1239_v50 = vld [vmem:[%s2960_s5 + $0x318] sm:$0xff] }
 0x240   : > { %1844 = vmatprep.subr.bf16.mxu0 %v1843_v53  ;;  %v1875_v53 = vpack.c.bf16 %v1245_v51, %v1239_v50  ;;  %v1911_v51 = vpack.c.bf16 %v1235_v49, %v1229_v48 }
 0x2ed   : > { %v1131_v57 = vpop.f32.mrb[2].mxu0 }
 0x2ee   : > { %v1136_v60 = vmul.f32 0.01, %v1131_v57  ;;  %v1133_v61 = vpop.f32.mrb[3].mxu0 }
 0x2ef   : > { %v1137_v1 = vmul.f32 0.01, %v1133_v61 }
 0x2f0   : > { %v2700_v6 = vmax.f32 %v1131_v57, %v1136_v60  ;;  %v1257_v57 = vld [vmem:[%s2960_s5 + $0x3a8] sm:$0xff]  ;;  %v1877_v60 = vpack.c.bf16 %v1244_v55, %v1238_v54  ;;  %v1247_v55 = vld [vmem:[%s2960_s5 + $0x358] sm:$0xff] }
 0x2f1   : > { %v2698_v4 = vmax.f32 %v1133_v61, %v1137_v1  ;;  %v1879_v61 = vpack.c.bf16 %v1257_v57, %v1251_v56  ;;  %v1145_v1 = vld [vmem:[%s2960_s5 + $0x28] sm:$0xff] }
 0x2f2   : > { %v1241_v54 = vld [vmem:[%s2960_s5 + $0x328] sm:$0xff] }
 0x2f3   : > { %1620 = vmatprep.mubr.msk.f32.mxu0 %vm1292_vm3, %v2698_v4  ;;  %v1915_v57 = vpack.c.bf16 %v1247_v55, %v1241_v54 }
 0x2f4   : > { %1361 = vmatmul.mubr.f32.vlgmr.msra.gmra.mrb[4].mxu0 %v2700_v6 }
 0x2f5   : > { %1846 = vmatpush1.bf16.msra.mxu0 %v1845_v5  ;;  %1621 = vmatprep.mubr.msk.f32.mxu0 %vm1292_vm3, %v2698_v4  ;;  %v1883_v5 = vpack.c.bf16 %v1151_v2, %v1145_v1  ;;  %v1919_v2 = vpack.c.bf16 %v1259_v0, %v1253_v63 }
 0x2f6   : > { %1848 = vmatprep.subr.bf16.mxu0 %v1847_v8  ;;  %v1144_v8 = vld [vmem:[%s2960_s5 + $0x20] sm:$0xff] }
 0x2f7   : > { %v1885_v11 = vpack.c.bf16 %v1150_v9, %v1144_v8  ;;  %v1260_v9 = vld [vmem:[%s2961_s6] sm:$0x3f] }
 0x2f8   : > { %v1285_v24 = vrot.slane %v1260_v9, %v411_v22 }
 0x2f9   : > { %1850 = vmatpush1.bf16.msra.mxu0 %v1849_v12  ;;  %v1887_v12 = vpack.c.bf16 %v1163_v7, %v1157_v10 }
 0x2fa   : > { %1852 = vmatprep.subr.bf16.mxu0 %v1851_v13  ;;  %v1156_v13 = vld [vmem:[%s2960_s5 + $0x80] sm:$0xff] }
 0x2fb   : > { %v1889_v18 = vpack.c.bf16 %v1162_v14, %v1156_v13 }
 0x2fd   : > { %1854 = vmatpush1.bf16.msra.mxu0 %v1853_v19  ;;  %v1891_v19 = vpack.c.bf16 %v1175_v17, %v1169_v16 }
 0x2fe   : > { %1856 = vmatprep.subr.bf16.mxu0 %v1855_v20  ;;  %v1168_v20 = vld [vmem:[%s2960_s5 + $0xe0] sm:$0xff] }
 0x301   : > { %1858 = vmatpush1.bf16.msra.mxu0 %v1857_v27  ;;  %v1180_v27 = vld [vmem:[%s2960_s5 + $0x140] sm:$0xff] }
 0x302   : > { %1860 = vmatprep.subr.bf16.mxu0 %v1859_v28  ;;  %v1186_v28 = vld [vmem:[%s2960_s5 + $0x170] sm:$0xff] }
 0x303   : > { %v1897_v31 = vpack.c.bf16 %v1186_v28, %v1180_v27 }
 0x305   : > { %1862 = vmatpush1.bf16.msra.mxu0 %v1861_v33  ;;  %v1192_v33 = vld [vmem:[%s2960_s5 + $0x1a0] sm:$0xff] }
 0x306   : > { %1864 = vmatprep.subr.bf16.mxu0 %v1863_v34  ;;  %v1198_v34 = vld [vmem:[%s2960_s5 + $0x1d0] sm:$0xff] }
 0x307   : > { %v1901_v37 = vpack.c.bf16 %v1198_v34, %v1192_v33  ;;  %v1533_v33 = vpop.permute.xlu0 %1532 }
 0x309   : > { %1866 = vmatpush1.bf16.msra.mxu0 %v1865_v39  ;;  %v1204_v39 = vld [vmem:[%s2960_s5 + $0x200] sm:$0xff] }
 0x30a   : > { %1868 = vmatprep.subr.bf16.mxu0 %v1867_v40  ;;  %v1210_v40 = vld [vmem:[%s2960_s5 + $0x230] sm:$0xff] }
 0x30b   : > { %v1905_v44 = vpack.c.bf16 %v1210_v40, %v1204_v39 }
 0x30d   : > { %1870 = vmatpush1.bf16.msra.mxu0 %v1869_v46  ;;  %v1216_v46 = vld [vmem:[%s2960_s5 + $0x260] sm:$0xff] }
 0x30e   : > { %1872 = vmatprep.subr.bf16.mxu0 %v1871_v47  ;;  %v1222_v47 = vld [vmem:[%s2960_s5 + $0x290] sm:$0xff] }
 0x30f   : > { %v1909_v50 = vpack.c.bf16 %v1222_v47, %v1216_v46 }
 0x311   : > { %1874 = vmatpush1.bf16.msra.mxu0 %v1873_v52  ;;  %v1228_v52 = vld [vmem:[%s2960_s5 + $0x2c0] sm:$0xff] }
 0x312   : > { %1876 = vmatprep.subr.bf16.mxu0 %v1875_v53  ;;  %v1234_v53 = vld [vmem:[%s2960_s5 + $0x2f0] sm:$0xff] }
 0x313   : > { %v1913_v56 = vpack.c.bf16 %v1234_v53, %v1228_v52 }
 0x315   : > { %1878 = vmatpush1.bf16.msra.mxu0 %v1877_v60  ;;  %v1240_v60 = vld [vmem:[%s2960_s5 + $0x320] sm:$0xff] }
 0x316   : > { %1880 = vmatprep.subr.bf16.mxu0 %v1879_v61  ;;  %v1246_v61 = vld [vmem:[%s2960_s5 + $0x350] sm:$0xff] }
 0x317   : > { %v1917_v1 = vpack.c.bf16 %v1246_v61, %v1240_v60 }
 0x319   : > { %1882 = vmatpush1.bf16.msra.mxu0 %v1881_v3  ;;  %v1252_v3 = vld [vmem:[%s2960_s5 + $0x380] sm:$0xff] }
 0x31a   : > { %1884 = vmatprep.subr.bf16.mxu0 %v1883_v5  ;;  %v1258_v5 = vld [vmem:[%s2960_s5 + $0x3b0] sm:$0xff] }
 0x31b   : > { %v1921_v8 = vpack.c.bf16 %v1258_v5, %v1252_v3 }
 0x31c   : > { %1432 = vmatmul.mubr.f32.vlgmr.msra.gmra.mrb[6].mxu0 %v2700_v6 }
 0x31d   : > { %1886 = vmatpush1.bf16.msra.mxu0 %v1885_v11  ;;  %1622 = vmatprep.mubr.msk.f32.mxu0 %vm1292_vm3, %v2698_v4  ;;  %v1893_v4 = vpack.c.bf16 %v1174_v23, %v1168_v20  ;;  %v1273_v11 = vrot.slane %v1260_v9, %v399_v41  ;;  %v1265_v23 = vrot.slane %v1260_v9, %v391_v59 }
 0x31e   : > { %1888 = vmatprep.subr.bf16.mxu0 %v1887_v12  ;;  %v1277_v12 = vrot.slane %v1260_v9, %v403_v15  ;;  %v1281_v41 = vrot.slane %v1260_v9, %v407_v21  ;;  %v1269_v15 = vrot.slane %v1260_v9, %v395_v62 }
 0x320   : > { %v1931_v25 = vadd.f32 %v1281_v41, %v1265_v23 }
 0x321   : > { %1890 = vmatpush1.bf16.msra.mxu0 %v1889_v18 }
 0x322   : > { %1892 = vmatprep.subr.bf16.mxu0 %v1891_v19 }
 0x325   : > { %1894 = vmatpush1.bf16.msra.mxu0 %v1893_v4  ;;  %v1934_v4 = vadd.f32 %v1285_v24, %v1269_v15 }
 0x326   : > { %1896 = vmatprep.subr.bf16.mxu0 %v1895_v26 }
 0x329   : > { %1898 = vmatpush1.bf16.msra.mxu0 %v1897_v31 }
 0x32a   : > { %1900 = vmatprep.subr.bf16.mxu0 %v1899_v32 }
 0x32d   : > { %1902 = vmatpush1.bf16.msra.mxu0 %v1901_v37  ;;  %v1541_v37 = vpop.permute.xlu0 %1540 }
 0x32e   : > { %1904 = vmatprep.subr.bf16.mxu0 %v1903_v38 }
 0x331   : > { %1906 = vmatpush1.bf16.msra.mxu0 %v1905_v44 }
 0x332   : > { %1908 = vmatprep.subr.bf16.mxu0 %v1907_v45 }
 0x335   : > { %1910 = vmatpush1.bf16.msra.mxu0 %v1909_v50 }
 0x336   : > { %1912 = vmatprep.subr.bf16.mxu0 %v1911_v51 }
 0x339   : > { %1914 = vmatpush1.bf16.msra.mxu0 %v1913_v56 }
 0x33a   : > { %1916 = vmatprep.subr.bf16.mxu0 %v1915_v57 }
 0x33d   : > { %1918 = vmatpush1.bf16.msra.mxu0 %v1917_v1 }
 0x33e   : > { %1920 = vmatprep.subr.bf16.mxu0 %v1919_v2 }
 0x341   : > { %1922 = vmatpush1.bf16.msra.mxu0 %v1921_v8 }
 0x344   : > { %1503 = vmatmul.mubr.f32.vlgmr.msra.gmra.mrb[4].mxu0 %v2700_v6 }
 0x3ef   : > { %v1433_v10 = vpop.f32.mrb[6].mxu0 }
 0x3f0   : > { %v1435_v7 = vpop.f32.mrb[7].mxu0  ;;  %v1434_v13 = vadd.f32 %v1433_v10, %v1273_v11 }
 0x3f1   : > { %v1436_v14 = vadd.f32 %v1435_v7, %v1277_v12 }
 0x3f2   : > { %v1623_v16 = vmul.f32 -1.442695, %v1434_v13 }
 0x3f3   : > { %v1624_v17 = vmul.f32 -1.442695, %v1436_v14 }
 0x3f4   : > { %1966 = vpow2.f32 %v1623_v16 }
 0x3f5   : > { %1968 = vpow2.f32 %v1624_v17 }
 0x3fe   : > { %v1967_v18 = vpop.eup %1966 }
 0x3ff   : > { %v1969_v6 = vpop.eup %1968  ;;  %v1515_v19 = vadd.f32 1.0, %v1967_v18 }
 0x400   : > { %v1516_v20 = vadd.f32 1.0, %v1969_v6 }
 0x401   : > { %1970 = vrcp.f32 %v1515_v19 }
 0x402   : > { %1972 = vrcp.f32 %v1516_v20 }
 0x40b   : > { %v1971_v29 = vpop.eup %1970 }
 0x40c   : > { %v1973_v31 = vpop.eup %1972 }
 0x417   : > { %v1504_v26 = vpop.f32.mrb[4].mxu0 }
 0x418   : > { %v1932_v27 = vadd.f32 %v1931_v25, %v1504_v26  ;;  %v1506_v28 = vpop.f32.mrb[5].mxu0 }
 0x419   : > { %v1935_v30 = vadd.f32 %v1934_v4, %v1506_v28 }
 0x41a   : > { %v1933_v32 = vadd.f32 %v1971_v29, %v1932_v27 }
 0x41b   : > { %v1936_v59 = vadd.f32 %v1973_v31, %v1935_v30 }
 0x41c   : > { %v1525_v34 = vmul.f32 0.01, %v1933_v32 }
 0x41d   : > { %v1526_v21 = vmul.f32 0.01, %v1936_v59 }
 0x41e   : > { %v1527_v35 = vmax.f32 %v1933_v32, %v1525_v34 }
 0x41f   : > { %v1528_v62 = vmax.f32 %v1936_v59, %v1526_v21 }
 0x420   : > { %v1535_v36 = vmul.f32 %v1533_v33, %v1527_v35 }
 0x421   : > { %v1536_v58 = vmul.f32 %v1533_v33, %v1528_v62 }
 0x422   : > { %v1543_v22 = vadd.f32 %v1541_v37, %v1535_v36 }
 0x423   : > { %v1544_v38 = vadd.f32 %v1541_v37, %v1536_v58 }
 0x424   : > { %1545 = vst [vmem:[%s329_s19] sm:$0xff] %v1543_v22 }
 0x425   : > { %1546 = vst [vmem:[%s329_s19 + $0x8] sm:$0xff] %v1544_v38 }
 0x426 PF: > { %s19_s30 = sadd.s32 1, %s1980_s30  }
 0x427   : > { %p16_p4 = scmp.ge.s32.totalorder %s19_s30, 4  }
 0x429   :  { %18 = sbr.rel (!%p16_p4) target bundleno = 1 (0x1), region = 86 }

</bundles_post_ra>
